<compile_context>
chip_gen: v7x
topology: tpu7x:2x2x1
jax: 0.10.0
libtpu: 0.0.40
codegen_flags: <defaults>
</compile_context>

<pallas_src>
import jax
import jax.numpy as jnp
from jax import lax
from jax.experimental import pallas as pl
from jax.experimental.pallas import tpu as pltpu

F_IN, F_PAD = 784, 896      # 896 = 7 * 128
H1 = 128
H2, H2_PAD = 64, 128
N_OUT, N_PAD = 10, 128
NEG = -1e30


def _kwinner(x, k):
    """Keep per-row top-k values of x (TB, 128) f32, zero the rest."""
    def body(_, cur):
        m = jnp.max(cur, axis=-1, keepdims=True)
        return jnp.where(cur >= m, -jnp.inf, cur)

    # Fully unrolled so the short dependent max/select chain is visible to the
    # scheduler instead of a serialized scf.for.
    cur = lax.fori_loop(0, k - 1, body, x, unroll=True)
    thresh = jnp.max(cur, axis=-1, keepdims=True)   # k-th largest per row
    return jnp.where(x >= thresh, x, 0.0)


def _sparse_mlp_kernel(x_ref, w1_ref, b1_ref, w2_ref, b2_ref, w3_ref, b3_ref,
                       o_ref):
    x = x_ref[...]                                                # (TB, 896) bf16

    h1 = jnp.dot(x, w1_ref[...], preferred_element_type=jnp.float32)
    h1 = h1 + b1_ref[...]                                         # (TB, 128) f32
    h1 = _kwinner(h1, 40)

    h2 = jnp.dot(h1.astype(jnp.bfloat16), w2_ref[...],
                 preferred_element_type=jnp.float32)
    h2 = h2 + b2_ref[...]                # (TB, 128) f32, padded lanes ~= -1e30
    h2 = _kwinner(h2, 20)                # padded lanes never win -> become 0

    out = jnp.dot(h2.astype(jnp.bfloat16), w3_ref[...],
                  preferred_element_type=jnp.float32)
    out = out + b3_ref[...]                                       # (TB, 128)
    o_ref[...] = out.astype(o_ref.dtype)


def prepare_params(params):
    """One-time glue: mask, transpose, pad and cast the weights."""
    (w1, m1, b1), (w2, m2, b2), (w3, b3) = params

    # Layer 1: masked (128,784) -> (784,128), K padded 784 -> 896 with zeros.
    w1m = (w1 * m1).T
    w1p = jnp.zeros((F_PAD, H1), jnp.float32).at[:F_IN].set(w1m)
    b1p = b1.reshape(1, H1).astype(jnp.float32)

    # Layer 2: masked (64,128) -> (128,64), N padded 64 -> 128.  Padded bias
    # lanes are -1e30 so they never survive KWinner(20).
    w2m = (w2 * m2).T
    w2p = jnp.zeros((H1, H2_PAD), jnp.float32).at[:, :H2].set(w2m)
    b2p = jnp.full((1, H2_PAD), NEG, jnp.float32).at[0, :H2].set(b2)

    # Layer 3: (10,64) -> (64,10), padded to (128,128) with zeros.
    w3t = w3.T
    w3p = jnp.zeros((H2_PAD, N_PAD), jnp.float32).at[:H2, :N_OUT].set(w3t)
    b3p = jnp.zeros((1, N_PAD), jnp.float32).at[0, :N_OUT].set(b3)

    return (w1p.astype(jnp.bfloat16), b1p,
            w2p.astype(jnp.bfloat16), b2p,
            w3p.astype(jnp.bfloat16), b3p)


def sparse_mlp(x, prepared):
    """x: (B, C, H, W) NCHW float32 with C*H*W == 784."""
    w1p, b1p, w2p, b2p, w3p, b3p = prepared
    B = x.shape[0]
    x_flat = x.reshape(B, -1).astype(jnp.float32)                 # Flatten

    # Batch tile: multiple of 8 sublanes; cap at 256 rows per grid step
    # (fits comfortably in v7x's 64 MiB VMEM with double buffering).
    TB = 256
    if B <= TB:
        TB = max(8, -(-B // 8) * 8)
    Bp = -(-B // TB) * TB

    # Zero-pad batch to a TB multiple and features 784 -> 896 (lane-dense K).
    xp = jnp.zeros((Bp, F_PAD), jnp.float32).at[:B, :F_IN].set(x_flat)
    xp = xp.astype(jnp.bfloat16)

    out = pl.pallas_call(
        _sparse_mlp_kernel,
        out_shape=jax.ShapeDtypeStruct((Bp, N_PAD), jnp.float32),
        grid=(Bp // TB,),
        in_specs=[
            pl.BlockSpec((TB, F_PAD), lambda i: (i, 0)),       # x (streamed)
            pl.BlockSpec((F_PAD, H1), lambda i: (0, 0)),       # w1 (resident)
            pl.BlockSpec((1, H1), lambda i: (0, 0)),           # b1
            pl.BlockSpec((H1, H2_PAD), lambda i: (0, 0)),      # w2
            pl.BlockSpec((1, H2_PAD), lambda i: (0, 0)),       # b2
            pl.BlockSpec((H2_PAD, N_PAD), lambda i: (0, 0)),   # w3
            pl.BlockSpec((1, N_PAD), lambda i: (0, 0)),        # b3
        ],
        out_specs=pl.BlockSpec((TB, N_PAD), lambda i: (i, 0)),
        compiler_params=pltpu.CompilerParams(
            dimension_semantics=("parallel",)),
    )(xp, w1p, b1p, w2p, b2p, w3p, b3p)

    return out[:B, :N_OUT]


def init_params(key):
    """Deterministic parameter init (PyTorch-style uniform(-1/sqrt(in), ...))."""
    def linear(key, fan_in, fan_out):
        kw, kb = jax.random.split(key)
        bound = 1.0 / jnp.sqrt(fan_in)
        w = jax.random.uniform(kw, (fan_out, fan_in), jnp.float32, -bound, bound)
        b = jax.random.uniform(kb, (fan_out,), jnp.float32, -bound, bound)
        return w, b

    k1, k2, k3, km1, km2 = jax.random.split(key, 5)
    w1, b1 = linear(k1, 784, 128)
    w2, b2 = linear(k2, 128, 64)
    w3, b3 = linear(k3, 64, 10)
    # Fixed binary masks for SparseLinear (50% weight density).
    m1 = (jax.random.uniform(km1, (128, 784)) < 0.5).astype(jnp.float32)
    m2 = (jax.random.uniform(km2, (64, 128)) < 0.5).astype(jnp.float32)
    return (w1, m1, b1), (w2, m2, b2), (w3, b3)


if __name__ == "__main__":
    key = jax.random.PRNGKey(0)
    kx, kp = jax.random.split(key)

    # Input consistent with Flatten -> 784 features: (B=2, C=1, 28, 28) NCHW.
    x = jax.random.normal(kx, (2, 1, 28, 28), dtype=jnp.float32)
    params = init_params(kp)
    prepared = prepare_params(params)   # one-time weight prep (hoisted glue)

    out = sparse_mlp(x, prepared)
    jax.block_until_ready(out)
    assert out.shape == (2, 10) and out.dtype == jnp.float32
    print("KERNEL_OK")
</pallas_src>

<mosaic_0001>
module attributes {stable_mosaic.version = 11 : i64} {
  func.func @_sparse_mlp_kernel(%arg0: i32, %arg1: memref<8x896xbf16, #tpu.memory_space<vmem>>, %arg2: memref<896x128xbf16, #tpu.memory_space<vmem>>, %arg3: memref<1x128xf32, #tpu.memory_space<vmem>>, %arg4: memref<128x128xbf16, #tpu.memory_space<vmem>>, %arg5: memref<1x128xf32, #tpu.memory_space<vmem>>, %arg6: memref<128x128xbf16, #tpu.memory_space<vmem>>, %arg7: memref<1x128xf32, #tpu.memory_space<vmem>>, %arg8: memref<8x128xf32, #tpu.memory_space<vmem>>) attributes {dimension_semantics = [#tpu.dimension_semantics<parallel>], iteration_bounds = array<i64: 1>, scalar_prefetch = 0 : i64, scratch_operands = 0 : i64, tpu.core_type = #tpu.core_type<tc>, window_params = [{transform_indices = @transform_0, window_bounds = array<i64: 8, 896>}, {pipeline_mode = #tpu.pipeline_mode<synchronous>, transform_indices = @transform_1, window_bounds = array<i64: 896, 128>}, {pipeline_mode = #tpu.pipeline_mode<synchronous>, transform_indices = @transform_2, window_bounds = array<i64: 1, 128>}, {pipeline_mode = #tpu.pipeline_mode<synchronous>, transform_indices = @transform_3, window_bounds = array<i64: 128, 128>}, {pipeline_mode = #tpu.pipeline_mode<synchronous>, transform_indices = @transform_4, window_bounds = array<i64: 1, 128>}, {pipeline_mode = #tpu.pipeline_mode<synchronous>, transform_indices = @transform_5, window_bounds = array<i64: 128, 128>}, {pipeline_mode = #tpu.pipeline_mode<synchronous>, transform_indices = @transform_6, window_bounds = array<i64: 1, 128>}, {transform_indices = @transform_7, window_bounds = array<i64: 8, 128>}]} {
    %c0 = arith.constant 0 : index
    %c0_0 = arith.constant 0 : index
    %0 = vector.load %arg1[%c0, %c0_0] : memref<8x896xbf16, #tpu.memory_space<vmem>>, vector<8x896xbf16>
    %c0_1 = arith.constant 0 : index
    %c0_2 = arith.constant 0 : index
    %1 = vector.load %arg2[%c0_1, %c0_2] : memref<896x128xbf16, #tpu.memory_space<vmem>>, vector<896x128xbf16>
    %cst = arith.constant dense<0.000000e+00> : vector<8x128xf32>
    %2 = tpu.matmul %0, %1, %cst {dimension_numbers = #tpu.dot_dimension_numbers<[1], [0], [0], [1], [0, 0, 1, 1], [], []>} : vector<8x896xbf16>, vector<896x128xbf16>, vector<8x128xf32> -> vector<8x128xf32>
    %c0_3 = arith.constant 0 : index
    %c0_4 = arith.constant 0 : index
    %3 = vector.load %arg3[%c0_3, %c0_4] : memref<1x128xf32, #tpu.memory_space<vmem>>, vector<1x128xf32>
    %4 = vector.broadcast %3 : vector<1x128xf32> to vector<8x128xf32>
    %5 = arith.addf %2, %4 : vector<8x128xf32>
    %c0_i32 = arith.constant 0 : i32
    %cst_5 = arith.constant dense<0xFF800000> : vector<8xf32>
    %6 = vector.multi_reduction <maximumf>, %5, %cst_5 [1] : vector<8x128xf32> to vector<8xf32>
    %7 = vector.shape_cast %6 : vector<8xf32> to vector<8x1xf32>
    %8 = vector.broadcast %7 : vector<8x1xf32> to vector<8x128xf32>
    %9 = arith.cmpf oge, %5, %8 : vector<8x128xf32>
    %cst_6 = arith.constant 0xFF800000 : f32
    %10 = vector.broadcast %cst_6 : f32 to vector<8x128xf32>
    %11 = arith.select %9, %10, %5 : vector<8x128xi1>, vector<8x128xf32>
    %c1_i32 = arith.constant 1 : i32
    %cst_7 = arith.constant dense<0xFF800000> : vector<8xf32>
    %12 = vector.multi_reduction <maximumf>, %11, %cst_7 [1] : vector<8x128xf32> to vector<8xf32>
    %13 = vector.shape_cast %12 : vector<8xf32> to vector<8x1xf32>
    %14 = vector.broadcast %13 : vector<8x1xf32> to vector<8x128xf32>
    %15 = arith.cmpf oge, %11, %14 : vector<8x128xf32>
    %cst_8 = arith.constant 0xFF800000 : f32
    %16 = vector.broadcast %cst_8 : f32 to vector<8x128xf32>
    %17 = arith.select %15, %16, %11 : vector<8x128xi1>, vector<8x128xf32>
    %c2_i32 = arith.constant 2 : i32
    %cst_9 = arith.constant dense<0xFF800000> : vector<8xf32>
    %18 = vector.multi_reduction <maximumf>, %17, %cst_9 [1] : vector<8x128xf32> to vector<8xf32>
    %19 = vector.shape_cast %18 : vector<8xf32> to vector<8x1xf32>
    %20 = vector.broadcast %19 : vector<8x1xf32> to vector<8x128xf32>
    %21 = arith.cmpf oge, %17, %20 : vector<8x128xf32>
    %cst_10 = arith.constant 0xFF800000 : f32
    %22 = vector.broadcast %cst_10 : f32 to vector<8x128xf32>
    %23 = arith.select %21, %22, %17 : vector<8x128xi1>, vector<8x128xf32>
    %c3_i32 = arith.constant 3 : i32
    %cst_11 = arith.constant dense<0xFF800000> : vector<8xf32>
    %24 = vector.multi_reduction <maximumf>, %23, %cst_11 [1] : vector<8x128xf32> to vector<8xf32>
    %25 = vector.shape_cast %24 : vector<8xf32> to vector<8x1xf32>
    %26 = vector.broadcast %25 : vector<8x1xf32> to vector<8x128xf32>
    %27 = arith.cmpf oge, %23, %26 : vector<8x128xf32>
    %cst_12 = arith.constant 0xFF800000 : f32
    %28 = vector.broadcast %cst_12 : f32 to vector<8x128xf32>
    %29 = arith.select %27, %28, %23 : vector<8x128xi1>, vector<8x128xf32>
    %c4_i32 = arith.constant 4 : i32
    %cst_13 = arith.constant dense<0xFF800000> : vector<8xf32>
    %30 = vector.multi_reduction <maximumf>, %29, %cst_13 [1] : vector<8x128xf32> to vector<8xf32>
    %31 = vector.shape_cast %30 : vector<8xf32> to vector<8x1xf32>
    %32 = vector.broadcast %31 : vector<8x1xf32> to vector<8x128xf32>
    %33 = arith.cmpf oge, %29, %32 : vector<8x128xf32>
    %cst_14 = arith.constant 0xFF800000 : f32
    %34 = vector.broadcast %cst_14 : f32 to vector<8x128xf32>
    %35 = arith.select %33, %34, %29 : vector<8x128xi1>, vector<8x128xf32>
    %c5_i32 = arith.constant 5 : i32
    %cst_15 = arith.constant dense<0xFF800000> : vector<8xf32>
    %36 = vector.multi_reduction <maximumf>, %35, %cst_15 [1] : vector<8x128xf32> to vector<8xf32>
    %37 = vector.shape_cast %36 : vector<8xf32> to vector<8x1xf32>
    %38 = vector.broadcast %37 : vector<8x1xf32> to vector<8x128xf32>
    %39 = arith.cmpf oge, %35, %38 : vector<8x128xf32>
    %cst_16 = arith.constant 0xFF800000 : f32
    %40 = vector.broadcast %cst_16 : f32 to vector<8x128xf32>
    %41 = arith.select %39, %40, %35 : vector<8x128xi1>, vector<8x128xf32>
    %c6_i32 = arith.constant 6 : i32
    %cst_17 = arith.constant dense<0xFF800000> : vector<8xf32>
    %42 = vector.multi_reduction <maximumf>, %41, %cst_17 [1] : vector<8x128xf32> to vector<8xf32>
    %43 = vector.shape_cast %42 : vector<8xf32> to vector<8x1xf32>
    %44 = vector.broadcast %43 : vector<8x1xf32> to vector<8x128xf32>
    %45 = arith.cmpf oge, %41, %44 : vector<8x128xf32>
    %cst_18 = arith.constant 0xFF800000 : f32
    %46 = vector.broadcast %cst_18 : f32 to vector<8x128xf32>
    %47 = arith.select %45, %46, %41 : vector<8x128xi1>, vector<8x128xf32>
    %c7_i32 = arith.constant 7 : i32
    %cst_19 = arith.constant dense<0xFF800000> : vector<8xf32>
    %48 = vector.multi_reduction <maximumf>, %47, %cst_19 [1] : vector<8x128xf32> to vector<8xf32>
    %49 = vector.shape_cast %48 : vector<8xf32> to vector<8x1xf32>
    %50 = vector.broadcast %49 : vector<8x1xf32> to vector<8x128xf32>
    %51 = arith.cmpf oge, %47, %50 : vector<8x128xf32>
    %cst_20 = arith.constant 0xFF800000 : f32
    %52 = vector.broadcast %cst_20 : f32 to vector<8x128xf32>
    %53 = arith.select %51, %52, %47 : vector<8x128xi1>, vector<8x128xf32>
    %c8_i32 = arith.constant 8 : i32
    %cst_21 = arith.constant dense<0xFF800000> : vector<8xf32>
    %54 = vector.multi_reduction <maximumf>, %53, %cst_21 [1] : vector<8x128xf32> to vector<8xf32>
    %55 = vector.shape_cast %54 : vector<8xf32> to vector<8x1xf32>
    %56 = vector.broadcast %55 : vector<8x1xf32> to vector<8x128xf32>
    %57 = arith.cmpf oge, %53, %56 : vector<8x128xf32>
    %cst_22 = arith.constant 0xFF800000 : f32
    %58 = vector.broadcast %cst_22 : f32 to vector<8x128xf32>
    %59 = arith.select %57, %58, %53 : vector<8x128xi1>, vector<8x128xf32>
    %c9_i32 = arith.constant 9 : i32
    %cst_23 = arith.constant dense<0xFF800000> : vector<8xf32>
    %60 = vector.multi_reduction <maximumf>, %59, %cst_23 [1] : vector<8x128xf32> to vector<8xf32>
    %61 = vector.shape_cast %60 : vector<8xf32> to vector<8x1xf32>
    %62 = vector.broadcast %61 : vector<8x1xf32> to vector<8x128xf32>
    %63 = arith.cmpf oge, %59, %62 : vector<8x128xf32>
    %cst_24 = arith.constant 0xFF800000 : f32
    %64 = vector.broadcast %cst_24 : f32 to vector<8x128xf32>
    %65 = arith.select %63, %64, %59 : vector<8x128xi1>, vector<8x128xf32>
    %c10_i32 = arith.constant 10 : i32
    %cst_25 = arith.constant dense<0xFF800000> : vector<8xf32>
    %66 = vector.multi_reduction <maximumf>, %65, %cst_25 [1] : vector<8x128xf32> to vector<8xf32>
    %67 = vector.shape_cast %66 : vector<8xf32> to vector<8x1xf32>
    %68 = vector.broadcast %67 : vector<8x1xf32> to vector<8x128xf32>
    %69 = arith.cmpf oge, %65, %68 : vector<8x128xf32>
    %cst_26 = arith.constant 0xFF800000 : f32
    %70 = vector.broadcast %cst_26 : f32 to vector<8x128xf32>
    %71 = arith.select %69, %70, %65 : vector<8x128xi1>, vector<8x128xf32>
    %c11_i32 = arith.constant 11 : i32
    %cst_27 = arith.constant dense<0xFF800000> : vector<8xf32>
    %72 = vector.multi_reduction <maximumf>, %71, %cst_27 [1] : vector<8x128xf32> to vector<8xf32>
    %73 = vector.shape_cast %72 : vector<8xf32> to vector<8x1xf32>
    %74 = vector.broadcast %73 : vector<8x1xf32> to vector<8x128xf32>
    %75 = arith.cmpf oge, %71, %74 : vector<8x128xf32>
    %cst_28 = arith.constant 0xFF800000 : f32
    %76 = vector.broadcast %cst_28 : f32 to vector<8x128xf32>
    %77 = arith.select %75, %76, %71 : vector<8x128xi1>, vector<8x128xf32>
    %c12_i32 = arith.constant 12 : i32
    %cst_29 = arith.constant dense<0xFF800000> : vector<8xf32>
    %78 = vector.multi_reduction <maximumf>, %77, %cst_29 [1] : vector<8x128xf32> to vector<8xf32>
    %79 = vector.shape_cast %78 : vector<8xf32> to vector<8x1xf32>
    %80 = vector.broadcast %79 : vector<8x1xf32> to vector<8x128xf32>
    %81 = arith.cmpf oge, %77, %80 : vector<8x128xf32>
    %cst_30 = arith.constant 0xFF800000 : f32
    %82 = vector.broadcast %cst_30 : f32 to vector<8x128xf32>
    %83 = arith.select %81, %82, %77 : vector<8x128xi1>, vector<8x128xf32>
    %c13_i32 = arith.constant 13 : i32
    %cst_31 = arith.constant dense<0xFF800000> : vector<8xf32>
    %84 = vector.multi_reduction <maximumf>, %83, %cst_31 [1] : vector<8x128xf32> to vector<8xf32>
    %85 = vector.shape_cast %84 : vector<8xf32> to vector<8x1xf32>
    %86 = vector.broadcast %85 : vector<8x1xf32> to vector<8x128xf32>
    %87 = arith.cmpf oge, %83, %86 : vector<8x128xf32>
    %cst_32 = arith.constant 0xFF800000 : f32
    %88 = vector.broadcast %cst_32 : f32 to vector<8x128xf32>
    %89 = arith.select %87, %88, %83 : vector<8x128xi1>, vector<8x128xf32>
    %c14_i32 = arith.constant 14 : i32
    %cst_33 = arith.constant dense<0xFF800000> : vector<8xf32>
    %90 = vector.multi_reduction <maximumf>, %89, %cst_33 [1] : vector<8x128xf32> to vector<8xf32>
    %91 = vector.shape_cast %90 : vector<8xf32> to vector<8x1xf32>
    %92 = vector.broadcast %91 : vector<8x1xf32> to vector<8x128xf32>
    %93 = arith.cmpf oge, %89, %92 : vector<8x128xf32>
    %cst_34 = arith.constant 0xFF800000 : f32
    %94 = vector.broadcast %cst_34 : f32 to vector<8x128xf32>
    %95 = arith.select %93, %94, %89 : vector<8x128xi1>, vector<8x128xf32>
    %c15_i32 = arith.constant 15 : i32
    %cst_35 = arith.constant dense<0xFF800000> : vector<8xf32>
    %96 = vector.multi_reduction <maximumf>, %95, %cst_35 [1] : vector<8x128xf32> to vector<8xf32>
    %97 = vector.shape_cast %96 : vector<8xf32> to vector<8x1xf32>
    %98 = vector.broadcast %97 : vector<8x1xf32> to vector<8x128xf32>
    %99 = arith.cmpf oge, %95, %98 : vector<8x128xf32>
    %cst_36 = arith.constant 0xFF800000 : f32
    %100 = vector.broadcast %cst_36 : f32 to vector<8x128xf32>
    %101 = arith.select %99, %100, %95 : vector<8x128xi1>, vector<8x128xf32>
    %c16_i32 = arith.constant 16 : i32
    %cst_37 = arith.constant dense<0xFF800000> : vector<8xf32>
    %102 = vector.multi_reduction <maximumf>, %101, %cst_37 [1] : vector<8x128xf32> to vector<8xf32>
    %103 = vector.shape_cast %102 : vector<8xf32> to vector<8x1xf32>
    %104 = vector.broadcast %103 : vector<8x1xf32> to vector<8x128xf32>
    %105 = arith.cmpf oge, %101, %104 : vector<8x128xf32>
    %cst_38 = arith.constant 0xFF800000 : f32
    %106 = vector.broadcast %cst_38 : f32 to vector<8x128xf32>
    %107 = arith.select %105, %106, %101 : vector<8x128xi1>, vector<8x128xf32>
    %c17_i32 = arith.constant 17 : i32
    %cst_39 = arith.constant dense<0xFF800000> : vector<8xf32>
    %108 = vector.multi_reduction <maximumf>, %107, %cst_39 [1] : vector<8x128xf32> to vector<8xf32>
    %109 = vector.shape_cast %108 : vector<8xf32> to vector<8x1xf32>
    %110 = vector.broadcast %109 : vector<8x1xf32> to vector<8x128xf32>
    %111 = arith.cmpf oge, %107, %110 : vector<8x128xf32>
    %cst_40 = arith.constant 0xFF800000 : f32
    %112 = vector.broadcast %cst_40 : f32 to vector<8x128xf32>
    %113 = arith.select %111, %112, %107 : vector<8x128xi1>, vector<8x128xf32>
    %c18_i32 = arith.constant 18 : i32
    %cst_41 = arith.constant dense<0xFF800000> : vector<8xf32>
    %114 = vector.multi_reduction <maximumf>, %113, %cst_41 [1] : vector<8x128xf32> to vector<8xf32>
    %115 = vector.shape_cast %114 : vector<8xf32> to vector<8x1xf32>
    %116 = vector.broadcast %115 : vector<8x1xf32> to vector<8x128xf32>
    %117 = arith.cmpf oge, %113, %116 : vector<8x128xf32>
    %cst_42 = arith.constant 0xFF800000 : f32
    %118 = vector.broadcast %cst_42 : f32 to vector<8x128xf32>
    %119 = arith.select %117, %118, %113 : vector<8x128xi1>, vector<8x128xf32>
    %c19_i32 = arith.constant 19 : i32
    %cst_43 = arith.constant dense<0xFF800000> : vector<8xf32>
    %120 = vector.multi_reduction <maximumf>, %119, %cst_43 [1] : vector<8x128xf32> to vector<8xf32>
    %121 = vector.shape_cast %120 : vector<8xf32> to vector<8x1xf32>
    %122 = vector.broadcast %121 : vector<8x1xf32> to vector<8x128xf32>
    %123 = arith.cmpf oge, %119, %122 : vector<8x128xf32>
    %cst_44 = arith.constant 0xFF800000 : f32
    %124 = vector.broadcast %cst_44 : f32 to vector<8x128xf32>
    %125 = arith.select %123, %124, %119 : vector<8x128xi1>, vector<8x128xf32>
    %c20_i32 = arith.constant 20 : i32
    %cst_45 = arith.constant dense<0xFF800000> : vector<8xf32>
    %126 = vector.multi_reduction <maximumf>, %125, %cst_45 [1] : vector<8x128xf32> to vector<8xf32>
    %127 = vector.shape_cast %126 : vector<8xf32> to vector<8x1xf32>
    %128 = vector.broadcast %127 : vector<8x1xf32> to vector<8x128xf32>
    %129 = arith.cmpf oge, %125, %128 : vector<8x128xf32>
    %cst_46 = arith.constant 0xFF800000 : f32
    %130 = vector.broadcast %cst_46 : f32 to vector<8x128xf32>
    %131 = arith.select %129, %130, %125 : vector<8x128xi1>, vector<8x128xf32>
    %c21_i32 = arith.constant 21 : i32
    %cst_47 = arith.constant dense<0xFF800000> : vector<8xf32>
    %132 = vector.multi_reduction <maximumf>, %131, %cst_47 [1] : vector<8x128xf32> to vector<8xf32>
    %133 = vector.shape_cast %132 : vector<8xf32> to vector<8x1xf32>
    %134 = vector.broadcast %133 : vector<8x1xf32> to vector<8x128xf32>
    %135 = arith.cmpf oge, %131, %134 : vector<8x128xf32>
    %cst_48 = arith.constant 0xFF800000 : f32
    %136 = vector.broadcast %cst_48 : f32 to vector<8x128xf32>
    %137 = arith.select %135, %136, %131 : vector<8x128xi1>, vector<8x128xf32>
    %c22_i32 = arith.constant 22 : i32
    %cst_49 = arith.constant dense<0xFF800000> : vector<8xf32>
    %138 = vector.multi_reduction <maximumf>, %137, %cst_49 [1] : vector<8x128xf32> to vector<8xf32>
    %139 = vector.shape_cast %138 : vector<8xf32> to vector<8x1xf32>
    %140 = vector.broadcast %139 : vector<8x1xf32> to vector<8x128xf32>
    %141 = arith.cmpf oge, %137, %140 : vector<8x128xf32>
    %cst_50 = arith.constant 0xFF800000 : f32
    %142 = vector.broadcast %cst_50 : f32 to vector<8x128xf32>
    %143 = arith.select %141, %142, %137 : vector<8x128xi1>, vector<8x128xf32>
    %c23_i32 = arith.constant 23 : i32
    %cst_51 = arith.constant dense<0xFF800000> : vector<8xf32>
    %144 = vector.multi_reduction <maximumf>, %143, %cst_51 [1] : vector<8x128xf32> to vector<8xf32>
    %145 = vector.shape_cast %144 : vector<8xf32> to vector<8x1xf32>
    %146 = vector.broadcast %145 : vector<8x1xf32> to vector<8x128xf32>
    %147 = arith.cmpf oge, %143, %146 : vector<8x128xf32>
    %cst_52 = arith.constant 0xFF800000 : f32
    %148 = vector.broadcast %cst_52 : f32 to vector<8x128xf32>
    %149 = arith.select %147, %148, %143 : vector<8x128xi1>, vector<8x128xf32>
    %c24_i32 = arith.constant 24 : i32
    %cst_53 = arith.constant dense<0xFF800000> : vector<8xf32>
    %150 = vector.multi_reduction <maximumf>, %149, %cst_53 [1] : vector<8x128xf32> to vector<8xf32>
    %151 = vector.shape_cast %150 : vector<8xf32> to vector<8x1xf32>
    %152 = vector.broadcast %151 : vector<8x1xf32> to vector<8x128xf32>
    %153 = arith.cmpf oge, %149, %152 : vector<8x128xf32>
    %cst_54 = arith.constant 0xFF800000 : f32
    %154 = vector.broadcast %cst_54 : f32 to vector<8x128xf32>
    %155 = arith.select %153, %154, %149 : vector<8x128xi1>, vector<8x128xf32>
    %c25_i32 = arith.constant 25 : i32
    %cst_55 = arith.constant dense<0xFF800000> : vector<8xf32>
    %156 = vector.multi_reduction <maximumf>, %155, %cst_55 [1] : vector<8x128xf32> to vector<8xf32>
    %157 = vector.shape_cast %156 : vector<8xf32> to vector<8x1xf32>
    %158 = vector.broadcast %157 : vector<8x1xf32> to vector<8x128xf32>
    %159 = arith.cmpf oge, %155, %158 : vector<8x128xf32>
    %cst_56 = arith.constant 0xFF800000 : f32
    %160 = vector.broadcast %cst_56 : f32 to vector<8x128xf32>
    %161 = arith.select %159, %160, %155 : vector<8x128xi1>, vector<8x128xf32>
    %c26_i32 = arith.constant 26 : i32
    %cst_57 = arith.constant dense<0xFF800000> : vector<8xf32>
    %162 = vector.multi_reduction <maximumf>, %161, %cst_57 [1] : vector<8x128xf32> to vector<8xf32>
    %163 = vector.shape_cast %162 : vector<8xf32> to vector<8x1xf32>
    %164 = vector.broadcast %163 : vector<8x1xf32> to vector<8x128xf32>
    %165 = arith.cmpf oge, %161, %164 : vector<8x128xf32>
    %cst_58 = arith.constant 0xFF800000 : f32
    %166 = vector.broadcast %cst_58 : f32 to vector<8x128xf32>
    %167 = arith.select %165, %166, %161 : vector<8x128xi1>, vector<8x128xf32>
    %c27_i32 = arith.constant 27 : i32
    %cst_59 = arith.constant dense<0xFF800000> : vector<8xf32>
    %168 = vector.multi_reduction <maximumf>, %167, %cst_59 [1] : vector<8x128xf32> to vector<8xf32>
    %169 = vector.shape_cast %168 : vector<8xf32> to vector<8x1xf32>
    %170 = vector.broadcast %169 : vector<8x1xf32> to vector<8x128xf32>
    %171 = arith.cmpf oge, %167, %170 : vector<8x128xf32>
    %cst_60 = arith.constant 0xFF800000 : f32
    %172 = vector.broadcast %cst_60 : f32 to vector<8x128xf32>
    %173 = arith.select %171, %172, %167 : vector<8x128xi1>, vector<8x128xf32>
    %c28_i32 = arith.constant 28 : i32
    %cst_61 = arith.constant dense<0xFF800000> : vector<8xf32>
    %174 = vector.multi_reduction <maximumf>, %173, %cst_61 [1] : vector<8x128xf32> to vector<8xf32>
    %175 = vector.shape_cast %174 : vector<8xf32> to vector<8x1xf32>
    %176 = vector.broadcast %175 : vector<8x1xf32> to vector<8x128xf32>
    %177 = arith.cmpf oge, %173, %176 : vector<8x128xf32>
    %cst_62 = arith.constant 0xFF800000 : f32
    %178 = vector.broadcast %cst_62 : f32 to vector<8x128xf32>
    %179 = arith.select %177, %178, %173 : vector<8x128xi1>, vector<8x128xf32>
    %c29_i32 = arith.constant 29 : i32
    %cst_63 = arith.constant dense<0xFF800000> : vector<8xf32>
    %180 = vector.multi_reduction <maximumf>, %179, %cst_63 [1] : vector<8x128xf32> to vector<8xf32>
    %181 = vector.shape_cast %180 : vector<8xf32> to vector<8x1xf32>
    %182 = vector.broadcast %181 : vector<8x1xf32> to vector<8x128xf32>
    %183 = arith.cmpf oge, %179, %182 : vector<8x128xf32>
    %cst_64 = arith.constant 0xFF800000 : f32
    %184 = vector.broadcast %cst_64 : f32 to vector<8x128xf32>
    %185 = arith.select %183, %184, %179 : vector<8x128xi1>, vector<8x128xf32>
    %c30_i32 = arith.constant 30 : i32
    %cst_65 = arith.constant dense<0xFF800000> : vector<8xf32>
    %186 = vector.multi_reduction <maximumf>, %185, %cst_65 [1] : vector<8x128xf32> to vector<8xf32>
    %187 = vector.shape_cast %186 : vector<8xf32> to vector<8x1xf32>
    %188 = vector.broadcast %187 : vector<8x1xf32> to vector<8x128xf32>
    %189 = arith.cmpf oge, %185, %188 : vector<8x128xf32>
    %cst_66 = arith.constant 0xFF800000 : f32
    %190 = vector.broadcast %cst_66 : f32 to vector<8x128xf32>
    %191 = arith.select %189, %190, %185 : vector<8x128xi1>, vector<8x128xf32>
    %c31_i32 = arith.constant 31 : i32
    %cst_67 = arith.constant dense<0xFF800000> : vector<8xf32>
    %192 = vector.multi_reduction <maximumf>, %191, %cst_67 [1] : vector<8x128xf32> to vector<8xf32>
    %193 = vector.shape_cast %192 : vector<8xf32> to vector<8x1xf32>
    %194 = vector.broadcast %193 : vector<8x1xf32> to vector<8x128xf32>
    %195 = arith.cmpf oge, %191, %194 : vector<8x128xf32>
    %cst_68 = arith.constant 0xFF800000 : f32
    %196 = vector.broadcast %cst_68 : f32 to vector<8x128xf32>
    %197 = arith.select %195, %196, %191 : vector<8x128xi1>, vector<8x128xf32>
    %c32_i32 = arith.constant 32 : i32
    %cst_69 = arith.constant dense<0xFF800000> : vector<8xf32>
    %198 = vector.multi_reduction <maximumf>, %197, %cst_69 [1] : vector<8x128xf32> to vector<8xf32>
    %199 = vector.shape_cast %198 : vector<8xf32> to vector<8x1xf32>
    %200 = vector.broadcast %199 : vector<8x1xf32> to vector<8x128xf32>
    %201 = arith.cmpf oge, %197, %200 : vector<8x128xf32>
    %cst_70 = arith.constant 0xFF800000 : f32
    %202 = vector.broadcast %cst_70 : f32 to vector<8x128xf32>
    %203 = arith.select %201, %202, %197 : vector<8x128xi1>, vector<8x128xf32>
    %c33_i32 = arith.constant 33 : i32
    %cst_71 = arith.constant dense<0xFF800000> : vector<8xf32>
    %204 = vector.multi_reduction <maximumf>, %203, %cst_71 [1] : vector<8x128xf32> to vector<8xf32>
    %205 = vector.shape_cast %204 : vector<8xf32> to vector<8x1xf32>
    %206 = vector.broadcast %205 : vector<8x1xf32> to vector<8x128xf32>
    %207 = arith.cmpf oge, %203, %206 : vector<8x128xf32>
    %cst_72 = arith.constant 0xFF800000 : f32
    %208 = vector.broadcast %cst_72 : f32 to vector<8x128xf32>
    %209 = arith.select %207, %208, %203 : vector<8x128xi1>, vector<8x128xf32>
    %c34_i32 = arith.constant 34 : i32
    %cst_73 = arith.constant dense<0xFF800000> : vector<8xf32>
    %210 = vector.multi_reduction <maximumf>, %209, %cst_73 [1] : vector<8x128xf32> to vector<8xf32>
    %211 = vector.shape_cast %210 : vector<8xf32> to vector<8x1xf32>
    %212 = vector.broadcast %211 : vector<8x1xf32> to vector<8x128xf32>
    %213 = arith.cmpf oge, %209, %212 : vector<8x128xf32>
    %cst_74 = arith.constant 0xFF800000 : f32
    %214 = vector.broadcast %cst_74 : f32 to vector<8x128xf32>
    %215 = arith.select %213, %214, %209 : vector<8x128xi1>, vector<8x128xf32>
    %c35_i32 = arith.constant 35 : i32
    %cst_75 = arith.constant dense<0xFF800000> : vector<8xf32>
    %216 = vector.multi_reduction <maximumf>, %215, %cst_75 [1] : vector<8x128xf32> to vector<8xf32>
    %217 = vector.shape_cast %216 : vector<8xf32> to vector<8x1xf32>
    %218 = vector.broadcast %217 : vector<8x1xf32> to vector<8x128xf32>
    %219 = arith.cmpf oge, %215, %218 : vector<8x128xf32>
    %cst_76 = arith.constant 0xFF800000 : f32
    %220 = vector.broadcast %cst_76 : f32 to vector<8x128xf32>
    %221 = arith.select %219, %220, %215 : vector<8x128xi1>, vector<8x128xf32>
    %c36_i32 = arith.constant 36 : i32
    %cst_77 = arith.constant dense<0xFF800000> : vector<8xf32>
    %222 = vector.multi_reduction <maximumf>, %221, %cst_77 [1] : vector<8x128xf32> to vector<8xf32>
    %223 = vector.shape_cast %222 : vector<8xf32> to vector<8x1xf32>
    %224 = vector.broadcast %223 : vector<8x1xf32> to vector<8x128xf32>
    %225 = arith.cmpf oge, %221, %224 : vector<8x128xf32>
    %cst_78 = arith.constant 0xFF800000 : f32
    %226 = vector.broadcast %cst_78 : f32 to vector<8x128xf32>
    %227 = arith.select %225, %226, %221 : vector<8x128xi1>, vector<8x128xf32>
    %c37_i32 = arith.constant 37 : i32
    %cst_79 = arith.constant dense<0xFF800000> : vector<8xf32>
    %228 = vector.multi_reduction <maximumf>, %227, %cst_79 [1] : vector<8x128xf32> to vector<8xf32>
    %229 = vector.shape_cast %228 : vector<8xf32> to vector<8x1xf32>
    %230 = vector.broadcast %229 : vector<8x1xf32> to vector<8x128xf32>
    %231 = arith.cmpf oge, %227, %230 : vector<8x128xf32>
    %cst_80 = arith.constant 0xFF800000 : f32
    %232 = vector.broadcast %cst_80 : f32 to vector<8x128xf32>
    %233 = arith.select %231, %232, %227 : vector<8x128xi1>, vector<8x128xf32>
    %c38_i32 = arith.constant 38 : i32
    %cst_81 = arith.constant dense<0xFF800000> : vector<8xf32>
    %234 = vector.multi_reduction <maximumf>, %233, %cst_81 [1] : vector<8x128xf32> to vector<8xf32>
    %235 = vector.shape_cast %234 : vector<8xf32> to vector<8x1xf32>
    %236 = vector.broadcast %235 : vector<8x1xf32> to vector<8x128xf32>
    %237 = arith.cmpf oge, %233, %236 : vector<8x128xf32>
    %cst_82 = arith.constant 0xFF800000 : f32
    %238 = vector.broadcast %cst_82 : f32 to vector<8x128xf32>
    %239 = arith.select %237, %238, %233 : vector<8x128xi1>, vector<8x128xf32>
    %cst_83 = arith.constant dense<0xFF800000> : vector<8xf32>
    %240 = vector.multi_reduction <maximumf>, %239, %cst_83 [1] : vector<8x128xf32> to vector<8xf32>
    %241 = vector.shape_cast %240 : vector<8xf32> to vector<8x1xf32>
    %242 = vector.broadcast %241 : vector<8x1xf32> to vector<8x128xf32>
    %243 = arith.cmpf oge, %5, %242 : vector<8x128xf32>
    %cst_84 = arith.constant 0.000000e+00 : f32
    %244 = vector.broadcast %cst_84 : f32 to vector<8x128xf32>
    %245 = arith.select %243, %5, %244 : vector<8x128xi1>, vector<8x128xf32>
    %246 = arith.truncf %245 : vector<8x128xf32> to vector<8x128xbf16>
    %c0_85 = arith.constant 0 : index
    %c0_86 = arith.constant 0 : index
    %247 = vector.load %arg4[%c0_85, %c0_86] : memref<128x128xbf16, #tpu.memory_space<vmem>>, vector<128x128xbf16>
    %cst_87 = arith.constant dense<0.000000e+00> : vector<8x128xf32>
    %248 = tpu.matmul %246, %247, %cst_87 {dimension_numbers = #tpu.dot_dimension_numbers<[1], [0], [0], [1], [0, 0, 1, 1], [], []>} : vector<8x128xbf16>, vector<128x128xbf16>, vector<8x128xf32> -> vector<8x128xf32>
    %c0_88 = arith.constant 0 : index
    %c0_89 = arith.constant 0 : index
    %249 = vector.load %arg5[%c0_88, %c0_89] : memref<1x128xf32, #tpu.memory_space<vmem>>, vector<1x128xf32>
    %250 = vector.broadcast %249 : vector<1x128xf32> to vector<8x128xf32>
    %251 = arith.addf %248, %250 : vector<8x128xf32>
    %c0_i32_90 = arith.constant 0 : i32
    %cst_91 = arith.constant dense<0xFF800000> : vector<8xf32>
    %252 = vector.multi_reduction <maximumf>, %251, %cst_91 [1] : vector<8x128xf32> to vector<8xf32>
    %253 = vector.shape_cast %252 : vector<8xf32> to vector<8x1xf32>
    %254 = vector.broadcast %253 : vector<8x1xf32> to vector<8x128xf32>
    %255 = arith.cmpf oge, %251, %254 : vector<8x128xf32>
    %cst_92 = arith.constant 0xFF800000 : f32
    %256 = vector.broadcast %cst_92 : f32 to vector<8x128xf32>
    %257 = arith.select %255, %256, %251 : vector<8x128xi1>, vector<8x128xf32>
    %c1_i32_93 = arith.constant 1 : i32
    %cst_94 = arith.constant dense<0xFF800000> : vector<8xf32>
    %258 = vector.multi_reduction <maximumf>, %257, %cst_94 [1] : vector<8x128xf32> to vector<8xf32>
    %259 = vector.shape_cast %258 : vector<8xf32> to vector<8x1xf32>
    %260 = vector.broadcast %259 : vector<8x1xf32> to vector<8x128xf32>
    %261 = arith.cmpf oge, %257, %260 : vector<8x128xf32>
    %cst_95 = arith.constant 0xFF800000 : f32
    %262 = vector.broadcast %cst_95 : f32 to vector<8x128xf32>
    %263 = arith.select %261, %262, %257 : vector<8x128xi1>, vector<8x128xf32>
    %c2_i32_96 = arith.constant 2 : i32
    %cst_97 = arith.constant dense<0xFF800000> : vector<8xf32>
    %264 = vector.multi_reduction <maximumf>, %263, %cst_97 [1] : vector<8x128xf32> to vector<8xf32>
    %265 = vector.shape_cast %264 : vector<8xf32> to vector<8x1xf32>
    %266 = vector.broadcast %265 : vector<8x1xf32> to vector<8x128xf32>
    %267 = arith.cmpf oge, %263, %266 : vector<8x128xf32>
    %cst_98 = arith.constant 0xFF800000 : f32
    %268 = vector.broadcast %cst_98 : f32 to vector<8x128xf32>
    %269 = arith.select %267, %268, %263 : vector<8x128xi1>, vector<8x128xf32>
    %c3_i32_99 = arith.constant 3 : i32
    %cst_100 = arith.constant dense<0xFF800000> : vector<8xf32>
    %270 = vector.multi_reduction <maximumf>, %269, %cst_100 [1] : vector<8x128xf32> to vector<8xf32>
    %271 = vector.shape_cast %270 : vector<8xf32> to vector<8x1xf32>
    %272 = vector.broadcast %271 : vector<8x1xf32> to vector<8x128xf32>
    %273 = arith.cmpf oge, %269, %272 : vector<8x128xf32>
    %cst_101 = arith.constant 0xFF800000 : f32
    %274 = vector.broadcast %cst_101 : f32 to vector<8x128xf32>
    %275 = arith.select %273, %274, %269 : vector<8x128xi1>, vector<8x128xf32>
    %c4_i32_102 = arith.constant 4 : i32
    %cst_103 = arith.constant dense<0xFF800000> : vector<8xf32>
    %276 = vector.multi_reduction <maximumf>, %275, %cst_103 [1] : vector<8x128xf32> to vector<8xf32>
    %277 = vector.shape_cast %276 : vector<8xf32> to vector<8x1xf32>
    %278 = vector.broadcast %277 : vector<8x1xf32> to vector<8x128xf32>
    %279 = arith.cmpf oge, %275, %278 : vector<8x128xf32>
    %cst_104 = arith.constant 0xFF800000 : f32
    %280 = vector.broadcast %cst_104 : f32 to vector<8x128xf32>
    %281 = arith.select %279, %280, %275 : vector<8x128xi1>, vector<8x128xf32>
    %c5_i32_105 = arith.constant 5 : i32
    %cst_106 = arith.constant dense<0xFF800000> : vector<8xf32>
    %282 = vector.multi_reduction <maximumf>, %281, %cst_106 [1] : vector<8x128xf32> to vector<8xf32>
    %283 = vector.shape_cast %282 : vector<8xf32> to vector<8x1xf32>
    %284 = vector.broadcast %283 : vector<8x1xf32> to vector<8x128xf32>
    %285 = arith.cmpf oge, %281, %284 : vector<8x128xf32>
    %cst_107 = arith.constant 0xFF800000 : f32
    %286 = vector.broadcast %cst_107 : f32 to vector<8x128xf32>
    %287 = arith.select %285, %286, %281 : vector<8x128xi1>, vector<8x128xf32>
    %c6_i32_108 = arith.constant 6 : i32
    %cst_109 = arith.constant dense<0xFF800000> : vector<8xf32>
    %288 = vector.multi_reduction <maximumf>, %287, %cst_109 [1] : vector<8x128xf32> to vector<8xf32>
    %289 = vector.shape_cast %288 : vector<8xf32> to vector<8x1xf32>
    %290 = vector.broadcast %289 : vector<8x1xf32> to vector<8x128xf32>
    %291 = arith.cmpf oge, %287, %290 : vector<8x128xf32>
    %cst_110 = arith.constant 0xFF800000 : f32
    %292 = vector.broadcast %cst_110 : f32 to vector<8x128xf32>
    %293 = arith.select %291, %292, %287 : vector<8x128xi1>, vector<8x128xf32>
    %c7_i32_111 = arith.constant 7 : i32
    %cst_112 = arith.constant dense<0xFF800000> : vector<8xf32>
    %294 = vector.multi_reduction <maximumf>, %293, %cst_112 [1] : vector<8x128xf32> to vector<8xf32>
    %295 = vector.shape_cast %294 : vector<8xf32> to vector<8x1xf32>
    %296 = vector.broadcast %295 : vector<8x1xf32> to vector<8x128xf32>
    %297 = arith.cmpf oge, %293, %296 : vector<8x128xf32>
    %cst_113 = arith.constant 0xFF800000 : f32
    %298 = vector.broadcast %cst_113 : f32 to vector<8x128xf32>
    %299 = arith.select %297, %298, %293 : vector<8x128xi1>, vector<8x128xf32>
    %c8_i32_114 = arith.constant 8 : i32
    %cst_115 = arith.constant dense<0xFF800000> : vector<8xf32>
    %300 = vector.multi_reduction <maximumf>, %299, %cst_115 [1] : vector<8x128xf32> to vector<8xf32>
    %301 = vector.shape_cast %300 : vector<8xf32> to vector<8x1xf32>
    %302 = vector.broadcast %301 : vector<8x1xf32> to vector<8x128xf32>
    %303 = arith.cmpf oge, %299, %302 : vector<8x128xf32>
    %cst_116 = arith.constant 0xFF800000 : f32
    %304 = vector.broadcast %cst_116 : f32 to vector<8x128xf32>
    %305 = arith.select %303, %304, %299 : vector<8x128xi1>, vector<8x128xf32>
    %c9_i32_117 = arith.constant 9 : i32
    %cst_118 = arith.constant dense<0xFF800000> : vector<8xf32>
    %306 = vector.multi_reduction <maximumf>, %305, %cst_118 [1] : vector<8x128xf32> to vector<8xf32>
    %307 = vector.shape_cast %306 : vector<8xf32> to vector<8x1xf32>
    %308 = vector.broadcast %307 : vector<8x1xf32> to vector<8x128xf32>
    %309 = arith.cmpf oge, %305, %308 : vector<8x128xf32>
    %cst_119 = arith.constant 0xFF800000 : f32
    %310 = vector.broadcast %cst_119 : f32 to vector<8x128xf32>
    %311 = arith.select %309, %310, %305 : vector<8x128xi1>, vector<8x128xf32>
    %c10_i32_120 = arith.constant 10 : i32
    %cst_121 = arith.constant dense<0xFF800000> : vector<8xf32>
    %312 = vector.multi_reduction <maximumf>, %311, %cst_121 [1] : vector<8x128xf32> to vector<8xf32>
    %313 = vector.shape_cast %312 : vector<8xf32> to vector<8x1xf32>
    %314 = vector.broadcast %313 : vector<8x1xf32> to vector<8x128xf32>
    %315 = arith.cmpf oge, %311, %314 : vector<8x128xf32>
    %cst_122 = arith.constant 0xFF800000 : f32
    %316 = vector.broadcast %cst_122 : f32 to vector<8x128xf32>
    %317 = arith.select %315, %316, %311 : vector<8x128xi1>, vector<8x128xf32>
    %c11_i32_123 = arith.constant 11 : i32
    %cst_124 = arith.constant dense<0xFF800000> : vector<8xf32>
    %318 = vector.multi_reduction <maximumf>, %317, %cst_124 [1] : vector<8x128xf32> to vector<8xf32>
    %319 = vector.shape_cast %318 : vector<8xf32> to vector<8x1xf32>
    %320 = vector.broadcast %319 : vector<8x1xf32> to vector<8x128xf32>
    %321 = arith.cmpf oge, %317, %320 : vector<8x128xf32>
    %cst_125 = arith.constant 0xFF800000 : f32
    %322 = vector.broadcast %cst_125 : f32 to vector<8x128xf32>
    %323 = arith.select %321, %322, %317 : vector<8x128xi1>, vector<8x128xf32>
    %c12_i32_126 = arith.constant 12 : i32
    %cst_127 = arith.constant dense<0xFF800000> : vector<8xf32>
    %324 = vector.multi_reduction <maximumf>, %323, %cst_127 [1] : vector<8x128xf32> to vector<8xf32>
    %325 = vector.shape_cast %324 : vector<8xf32> to vector<8x1xf32>
    %326 = vector.broadcast %325 : vector<8x1xf32> to vector<8x128xf32>
    %327 = arith.cmpf oge, %323, %326 : vector<8x128xf32>
    %cst_128 = arith.constant 0xFF800000 : f32
    %328 = vector.broadcast %cst_128 : f32 to vector<8x128xf32>
    %329 = arith.select %327, %328, %323 : vector<8x128xi1>, vector<8x128xf32>
    %c13_i32_129 = arith.constant 13 : i32
    %cst_130 = arith.constant dense<0xFF800000> : vector<8xf32>
    %330 = vector.multi_reduction <maximumf>, %329, %cst_130 [1] : vector<8x128xf32> to vector<8xf32>
    %331 = vector.shape_cast %330 : vector<8xf32> to vector<8x1xf32>
    %332 = vector.broadcast %331 : vector<8x1xf32> to vector<8x128xf32>
    %333 = arith.cmpf oge, %329, %332 : vector<8x128xf32>
    %cst_131 = arith.constant 0xFF800000 : f32
    %334 = vector.broadcast %cst_131 : f32 to vector<8x128xf32>
    %335 = arith.select %333, %334, %329 : vector<8x128xi1>, vector<8x128xf32>
    %c14_i32_132 = arith.constant 14 : i32
    %cst_133 = arith.constant dense<0xFF800000> : vector<8xf32>
    %336 = vector.multi_reduction <maximumf>, %335, %cst_133 [1] : vector<8x128xf32> to vector<8xf32>
    %337 = vector.shape_cast %336 : vector<8xf32> to vector<8x1xf32>
    %338 = vector.broadcast %337 : vector<8x1xf32> to vector<8x128xf32>
    %339 = arith.cmpf oge, %335, %338 : vector<8x128xf32>
    %cst_134 = arith.constant 0xFF800000 : f32
    %340 = vector.broadcast %cst_134 : f32 to vector<8x128xf32>
    %341 = arith.select %339, %340, %335 : vector<8x128xi1>, vector<8x128xf32>
    %c15_i32_135 = arith.constant 15 : i32
    %cst_136 = arith.constant dense<0xFF800000> : vector<8xf32>
    %342 = vector.multi_reduction <maximumf>, %341, %cst_136 [1] : vector<8x128xf32> to vector<8xf32>
    %343 = vector.shape_cast %342 : vector<8xf32> to vector<8x1xf32>
    %344 = vector.broadcast %343 : vector<8x1xf32> to vector<8x128xf32>
    %345 = arith.cmpf oge, %341, %344 : vector<8x128xf32>
    %cst_137 = arith.constant 0xFF800000 : f32
    %346 = vector.broadcast %cst_137 : f32 to vector<8x128xf32>
    %347 = arith.select %345, %346, %341 : vector<8x128xi1>, vector<8x128xf32>
    %c16_i32_138 = arith.constant 16 : i32
    %cst_139 = arith.constant dense<0xFF800000> : vector<8xf32>
    %348 = vector.multi_reduction <maximumf>, %347, %cst_139 [1] : vector<8x128xf32> to vector<8xf32>
    %349 = vector.shape_cast %348 : vector<8xf32> to vector<8x1xf32>
    %350 = vector.broadcast %349 : vector<8x1xf32> to vector<8x128xf32>
    %351 = arith.cmpf oge, %347, %350 : vector<8x128xf32>
    %cst_140 = arith.constant 0xFF800000 : f32
    %352 = vector.broadcast %cst_140 : f32 to vector<8x128xf32>
    %353 = arith.select %351, %352, %347 : vector<8x128xi1>, vector<8x128xf32>
    %c17_i32_141 = arith.constant 17 : i32
    %cst_142 = arith.constant dense<0xFF800000> : vector<8xf32>
    %354 = vector.multi_reduction <maximumf>, %353, %cst_142 [1] : vector<8x128xf32> to vector<8xf32>
    %355 = vector.shape_cast %354 : vector<8xf32> to vector<8x1xf32>
    %356 = vector.broadcast %355 : vector<8x1xf32> to vector<8x128xf32>
    %357 = arith.cmpf oge, %353, %356 : vector<8x128xf32>
    %cst_143 = arith.constant 0xFF800000 : f32
    %358 = vector.broadcast %cst_143 : f32 to vector<8x128xf32>
    %359 = arith.select %357, %358, %353 : vector<8x128xi1>, vector<8x128xf32>
    %c18_i32_144 = arith.constant 18 : i32
    %cst_145 = arith.constant dense<0xFF800000> : vector<8xf32>
    %360 = vector.multi_reduction <maximumf>, %359, %cst_145 [1] : vector<8x128xf32> to vector<8xf32>
    %361 = vector.shape_cast %360 : vector<8xf32> to vector<8x1xf32>
    %362 = vector.broadcast %361 : vector<8x1xf32> to vector<8x128xf32>
    %363 = arith.cmpf oge, %359, %362 : vector<8x128xf32>
    %cst_146 = arith.constant 0xFF800000 : f32
    %364 = vector.broadcast %cst_146 : f32 to vector<8x128xf32>
    %365 = arith.select %363, %364, %359 : vector<8x128xi1>, vector<8x128xf32>
    %cst_147 = arith.constant dense<0xFF800000> : vector<8xf32>
    %366 = vector.multi_reduction <maximumf>, %365, %cst_147 [1] : vector<8x128xf32> to vector<8xf32>
    %367 = vector.shape_cast %366 : vector<8xf32> to vector<8x1xf32>
    %368 = vector.broadcast %367 : vector<8x1xf32> to vector<8x128xf32>
    %369 = arith.cmpf oge, %251, %368 : vector<8x128xf32>
    %cst_148 = arith.constant 0.000000e+00 : f32
    %370 = vector.broadcast %cst_148 : f32 to vector<8x128xf32>
    %371 = arith.select %369, %251, %370 : vector<8x128xi1>, vector<8x128xf32>
    %372 = arith.truncf %371 : vector<8x128xf32> to vector<8x128xbf16>
    %c0_149 = arith.constant 0 : index
    %c0_150 = arith.constant 0 : index
    %373 = vector.load %arg6[%c0_149, %c0_150] : memref<128x128xbf16, #tpu.memory_space<vmem>>, vector<128x128xbf16>
    %cst_151 = arith.constant dense<0.000000e+00> : vector<8x128xf32>
    %374 = tpu.matmul %372, %373, %cst_151 {dimension_numbers = #tpu.dot_dimension_numbers<[1], [0], [0], [1], [0, 0, 1, 1], [], []>} : vector<8x128xbf16>, vector<128x128xbf16>, vector<8x128xf32> -> vector<8x128xf32>
    %c0_152 = arith.constant 0 : index
    %c0_153 = arith.constant 0 : index
    %375 = vector.load %arg7[%c0_152, %c0_153] : memref<1x128xf32, #tpu.memory_space<vmem>>, vector<1x128xf32>
    %376 = vector.broadcast %375 : vector<1x128xf32> to vector<8x128xf32>
    %377 = arith.addf %374, %376 : vector<8x128xf32>
    %c0_154 = arith.constant 0 : index
    %c0_155 = arith.constant 0 : index
    %378 = vector.load %arg8[%c0_154, %c0_155] : memref<8x128xf32, #tpu.memory_space<vmem>>, vector<8x128xf32>
    tpu.vector_store %arg8[%c0_154, %c0_155], %377 {strides = array<i32>} : memref<8x128xf32, #tpu.memory_space<vmem>>, vector<8x128xf32>,
    return
  }
  func.func @transform_0(%arg0: i32) -> (i32, i32) {
    %c0_i32 = arith.constant 0 : i32
    %c0_i32_0 = arith.constant 0 : i32
    return %arg0, %c0_i32 : i32, i32
  }
  func.func @transform_1(%arg0: i32) -> (i32, i32) {
    %c0_i32 = arith.constant 0 : i32
    %c0_i32_0 = arith.constant 0 : i32
    %c0_i32_1 = arith.constant 0 : i32
    return %c0_i32, %c0_i32_0 : i32, i32
  }
  func.func @transform_2(%arg0: i32) -> (i32, i32) {
    %c0_i32 = arith.constant 0 : i32
    %c0_i32_0 = arith.constant 0 : i32
    %c0_i32_1 = arith.constant 0 : i32
    return %c0_i32, %c0_i32_0 : i32, i32
  }
  func.func @transform_3(%arg0: i32) -> (i32, i32) {
    %c0_i32 = arith.constant 0 : i32
    %c0_i32_0 = arith.constant 0 : i32
    %c0_i32_1 = arith.constant 0 : i32
    return %c0_i32, %c0_i32_0 : i32, i32
  }
  func.func @transform_4(%arg0: i32) -> (i32, i32) {
    %c0_i32 = arith.constant 0 : i32
    %c0_i32_0 = arith.constant 0 : i32
    %c0_i32_1 = arith.constant 0 : i32
    return %c0_i32, %c0_i32_0 : i32, i32
  }
  func.func @transform_5(%arg0: i32) -> (i32, i32) {
    %c0_i32 = arith.constant 0 : i32
    %c0_i32_0 = arith.constant 0 : i32
    %c0_i32_1 = arith.constant 0 : i32
    return %c0_i32, %c0_i32_0 : i32, i32
  }
  func.func @transform_6(%arg0: i32) -> (i32, i32) {
    %c0_i32 = arith.constant 0 : i32
    %c0_i32_0 = arith.constant 0 : i32
    %c0_i32_1 = arith.constant 0 : i32
    return %c0_i32, %c0_i32_0 : i32, i32
  }
  func.func @transform_7(%arg0: i32) -> (i32, i32) {
    %c0_i32 = arith.constant 0 : i32
    %c0_i32_0 = arith.constant 0 : i32
    return %arg0, %c0_i32 : i32, i32
  }
}

</mosaic_0001>

<bundles_post_ra>
// kernel: tpu_custom_call.1
= control target key start
LH: loop header
LB: loop body
LE: loop exit
PB: predicated region body
PF: predicated region fallthrough
CT: control target
= control target key end

     0   :  { %12 = vsyncpa [#allocation3], 0  ;;  %s1827_s0 = inlined_call_operand.hbm [shape: bf16[8,896], index: 0, kind: input, shape index: {}]   ;;  %s1828_s1 = inlined_call_operand.hbm [shape: bf16[896,128], index: 1, kind: input, shape index: {}]   ;;  %s1829_s2 = inlined_call_operand.vmem [shape: f32[1,128], index: 2, kind: input, shape index: {}]   ;;  %s1830_s3 = inlined_call_operand.hbm [shape: bf16[128,128], index: 3, kind: input, shape index: {}]   ;;  %s1831_s4 = inlined_call_operand.vmem [shape: f32[1,128], index: 4, kind: input, shape index: {}]   ;;  %s1832_s5 = inlined_call_operand.hbm [shape: bf16[128,128], index: 5, kind: input, shape index: {}]   ;;  %s1833_s6 = inlined_call_operand.vmem [shape: f32[1,128], index: 6, kind: input, shape index: {}]   ;;  %s1834_s7 = inlined_call_operand.hbm [shape: f32[8,128], index: 7, kind: output, shape index: {}]  }
   0x1   :  { %13 = vsyncpa [#allocation6], 0 }
   0x2   :  { %14 = vsyncpa [#allocation9], 0 }
   0x3   :  { %15 = vsyncpa [#allocation4], 0  ;;  %s1654_s24 = smov [#allocation5]   ;;  %s1536_s28 = scalar_lea.hbm %s1828_s1, 7168 }
   0x4   :  { %s31_s25 = sshll.u32 %s1654_s24, 4  ;;  %p1537_p0 = scmp.ne.s32.totalorder %s1828_s1, %s1536_s28  ;;  %s32_s25 = int_to_ptr.vmem [resolvable:$true] %s31_s25 }
   0x5   :  { %p1540_p1 = scmp.lt.u32.totalorder %s1536_s28, %s1828_s1 }
   0x7   :  { %p1542_p2 = pnand %p1540_p1, %p1537_p0 }
   0x9   :  { %1545 = shalt.err (!%p1542_p2)
}
   0xa   :  { %s1546_s10 = scalar_lea.vmem %s32_s25, 7168  ;;  %p1551_p4 = scmp.lt.s32.totalorder %s32_s25, %s32_s25 }
   0xb   :  { %p1547_p3 = scmp.ne.s32.totalorder %s32_s25, %s1546_s10  ;;  %p1552_p5 = scmp.lt.s32.totalorder %s1546_s10, %s1546_s10 }
   0xd   :  { %p1553_p6 = por %p1552_p5, %p1551_p4 }
   0xf   :  { %p1554_p7 = pnand %p1553_p6, %p1547_p3 }
  0x11   :  { %1557 = shalt.err (!%p1554_p7)
}
  0x12   :  { %s1655_s11 = smov 64   ;;  %s1656_s12 = smov 4  }
  0x13   :  { %37 = dma.hbm_to_vmem [thread:$0]  %s1828_s1, 7168, %s32_s25, [#allocation6], %s1655_s11, %s1655_s11, %s1656_s12  }
  0x14   :  { %s1657_s15 = smov [#allocation2]   ;;  %s1658_s17 = smov [#allocation7]  }
  0x15   :  { %s22_s16 = sshll.u32 %s1657_s15, 4  ;;  %s45_s18 = sshll.u32 %s1658_s17, 4  ;;  %s23_s16 = int_to_ptr.vmem [resolvable:$true] %s22_s16  ;;  %s46_s18 = int_to_ptr.vmem [resolvable:$true] %s45_s18 }
  0x16   :  { %s1558_s21 = scalar_lea.hbm %s1827_s0, 448 }
  0x17   :  { %p1559_p8 = scmp.ne.s32.totalorder %s1827_s0, %s1558_s21  ;;  %p1562_p9 = scmp.lt.u32.totalorder %s1558_s21, %s1827_s0 }
  0x19   :  { %p1564_p10 = pnand %p1562_p9, %p1559_p8 }
  0x1b   :  { %1567 = shalt.err (!%p1564_p10)
}
  0x1c   :  { %s1568_s1 = scalar_lea.vmem %s23_s16, 448  ;;  %p1573_p12 = scmp.lt.s32.totalorder %s23_s16, %s23_s16 }
  0x1d   :  { %p1569_p11 = scmp.ne.s32.totalorder %s23_s16, %s1568_s1  ;;  %p1574_p13 = scmp.lt.s32.totalorder %s1568_s1, %s1568_s1 }
  0x1f   :  { %p1575_p0 = por %p1574_p13, %p1573_p12 }
  0x21   :  { %p1576_p1 = pnand %p1575_p0, %p1569_p11 }
  0x23   :  { %1579 = shalt.err (!%p1576_p1)
}
  0x24   :  { %25 = dma.hbm_to_vmem [thread:$0]  %s1827_s0, 448, %s23_s16, [#allocation3]  }
  0x25   :  { %s1580_s30 = scalar_lea.hbm %s1830_s3, 1024 }
  0x26   :  { %p1581_p2 = scmp.ne.s32.totalorder %s1830_s3, %s1580_s30  ;;  %p1584_p3 = scmp.lt.u32.totalorder %s1580_s30, %s1830_s3 }
  0x28   :  { %p1586_p4 = pnand %p1584_p3, %p1581_p2 }
  0x2a   :  { %1589 = shalt.err (!%p1586_p4)
}
  0x2b   :  { %s1590_s14 = scalar_lea.vmem %s46_s18, 1024  ;;  %p1595_p6 = scmp.lt.s32.totalorder %s46_s18, %s46_s18 }
  0x2c   :  { %p1591_p5 = scmp.ne.s32.totalorder %s46_s18, %s1590_s14  ;;  %p1596_p7 = scmp.lt.s32.totalorder %s1590_s14, %s1590_s14 }
  0x2e   :  { %p1597_p8 = por %p1596_p7, %p1595_p6 }
  0x30   :  { %p1598_p9 = pnand %p1597_p8, %p1591_p5 }
  0x32   :  { %1601 = shalt.err (!%p1598_p9)
}
  0x33   :  { %51 = dma.hbm_to_vmem [thread:$0]  %s1830_s3, 1024, %s46_s18, [#allocation6], %s1655_s11, %s1655_s11, %s1656_s12  }
  0x34   :  { %s1659_s16 = smov [#allocation8]   ;;  %s1602_s21 = scalar_lea.hbm %s1832_s5, 1024 }
  0x35   :  { %s59_s17 = sshll.u32 %s1659_s16, 4  ;;  %p1603_p10 = scmp.ne.s32.totalorder %s1832_s5, %s1602_s21  ;;  %s60_s17 = int_to_ptr.vmem [resolvable:$true] %s59_s17 }
  0x36   :  { %p1606_p11 = scmp.lt.u32.totalorder %s1602_s21, %s1832_s5 }
  0x38   :  { %p1608_p12 = pnand %p1606_p11, %p1603_p10 }
  0x3a   :  { %1611 = shalt.err (!%p1608_p12)
}
  0x3b   :  { %s1612_s1 = scalar_lea.vmem %s60_s17, 1024  ;;  %p1617_p0 = scmp.lt.s32.totalorder %s60_s17, %s60_s17 }
  0x3c   :  { %p1613_p13 = scmp.ne.s32.totalorder %s60_s17, %s1612_s1  ;;  %p1618_p1 = scmp.lt.s32.totalorder %s1612_s1, %s1612_s1 }
  0x3e   :  { %p1619_p2 = por %p1618_p1, %p1617_p0 }
  0x40   :  { %p1620_p3 = pnand %p1619_p2, %p1613_p13 }
  0x42   :  { %1623 = shalt.err (!%p1620_p3)
}
  0x43   :  { %65 = dma.hbm_to_vmem [thread:$0]  %s1832_s5, 1024, %s60_s17, [#allocation9], %s1655_s11, %s1655_s11, %s1656_s12  }
  0x44   :  { %1646 = dma.done.wait [#allocation3], 448  }
  0x45   :  { %1647 = vsyncadd [#allocation3], 4294966848 }
  0x46   :  { %1648 = dma.done.wait [#allocation6], 8192  }
  0x47   :  { %1649 = vsyncadd [#allocation6], 4294959104 }
  0x48   :  { %1650 = dma.done.wait [#allocation9], 1024  }
  0x49   :  { %1651 = vsyncadd [#allocation9], 4294966272  ;;  %v1457_v0 = vld [vmem:[#allocation5 + $0x40] sm:$0xff]   ;;  %v1461_v4 = vld [vmem:[#allocation5 + $0x48] sm:$0xff]   ;;  %v1660_v42 = vmov 0.0   ;;  %vm1661_vm0 = vmmov 0  }
  0x4a   :  { %v1458_v1 = vld [vmem:[#allocation5] sm:$0xff]   ;;  %1295 = vmatprep.subr.bf16.mxu0 %v1457_v0  ;;  %v1462_v5 = vld [vmem:[#allocation5 + $0x8] sm:$0xff]   ;;  %v1465_v8 = vld [vmem:[#allocation5 + $0x50] sm:$0xff]   ;;  %s1662_s27 = smov [#allocation10]  }
  0x4b   :  { %v1459_v2 = vld [vmem:[#allocation5 + $0xc0] sm:$0xff]   ;;  %1296 = vmatpush3.bf16.msra.mxu0 %v1458_v1  ;;  %v1463_v6 = vld [vmem:[#allocation5 + $0xc8] sm:$0xff]   ;;  %v1466_v9 = vld [vmem:[#allocation5 + $0x10] sm:$0xff]   ;;  %s1196_s28 = sshll.u32 %s1662_s27, 4  ;;  %s1197_s28 = int_to_ptr.vmem [resolvable:$true] %s1196_s28 }
  0x4c   :  { %v1460_v3 = vld [vmem:[#allocation5 + $0x80] sm:$0xff]   ;;  %1317 = vmatprep.subr.bf16.mxu1 %v1459_v2  ;;  %1297 = vmatprep.subr.bf16.mxu0 %v1461_v4  ;;  %v1464_v7 = vld [vmem:[#allocation5 + $0x88] sm:$0xff]   ;;  %v1467_v10 = vld [vmem:[#allocation5 + $0xd0] sm:$0xff]   ;;  %s1624_s29 = scalar_lea.vmem %s1197_s28, 128  ;;  %p1629_p5 = scmp.lt.s32.totalorder %s1197_s28, %s1197_s28 }
  0x4d   :  { %1318 = vmatpush3.bf16.msra.mxu1 %v1460_v3  ;;  %v1468_v11 = vld [vmem:[#allocation5 + $0x90] sm:$0xff]   ;;  %v1469_v12 = vld [vmem:[#allocation5 + $0x58] sm:$0xff]   ;;  %v1473_v16 = vld [vmem:[#allocation5 + $0x60] sm:$0xff]   ;;  %p1625_p4 = scmp.ne.s32.totalorder %s1197_s28, %s1624_s29  ;;  %p1630_p6 = scmp.lt.s32.totalorder %s1624_s29, %s1624_s29 }
  0x4e   :  { %1319 = vmatprep.subr.bf16.mxu1 %v1463_v6  ;;  %v1470_v13 = vld [vmem:[#allocation5 + $0x18] sm:$0xff]   ;;  %v1474_v17 = vld [vmem:[#allocation5 + $0x20] sm:$0xff]   ;;  %v1477_v20 = vld [vmem:[#allocation5 + $0x68] sm:$0xff]  }
  0x4f   :  { %1298 = vmatpush3.bf16.msra.mxu0 %v1462_v5  ;;  %v1471_v14 = vld [vmem:[#allocation5 + $0xd8] sm:$0xff]   ;;  %v1475_v18 = vld [vmem:[#allocation5 + $0xe0] sm:$0xff]   ;;  %v1478_v21 = vld [vmem:[#allocation5 + $0x28] sm:$0xff]   ;;  %p1631_p7 = por %p1630_p6, %p1629_p5 }
  0x50   :  { %1299 = vmatprep.subr.bf16.mxu0 %v1465_v8  ;;  %v1472_v15 = vld [vmem:[#allocation5 + $0x98] sm:$0xff]   ;;  %v1476_v19 = vld [vmem:[#allocation5 + $0xa0] sm:$0xff]   ;;  %v1479_v22 = vld [vmem:[#allocation5 + $0xe8] sm:$0xff]  }
  0x51   :  { %1320 = vmatpush3.bf16.msra.mxu1 %v1464_v7  ;;  %v1480_v23 = vld [vmem:[#allocation5 + $0xa8] sm:$0xff]   ;;  %v1481_v24 = vld [vmem:[#allocation5 + $0x70] sm:$0xff]   ;;  %v1485_v28 = vld [vmem:[#allocation5 + $0x78] sm:$0xff]   ;;  %p1632_p8 = pnand %p1631_p7, %p1625_p4 }
  0x52   :  { %1321 = vmatprep.subr.bf16.mxu1 %v1467_v10  ;;  %v1482_v25 = vld [vmem:[#allocation5 + $0x30] sm:$0xff]   ;;  %v1486_v29 = vld [vmem:[#allocation5 + $0x38] sm:$0xff]   ;;  %v81_v31 = vld [vmem:[#allocation2] sm:$0xff] }
  0x53   :  { %1300 = vmatpush3.bf16.msra.mxu0 %v1466_v9  ;;  %v1483_v26 = vld [vmem:[#allocation5 + $0xf0] sm:$0xff]   ;;  %v1487_v30 = vld [vmem:[#allocation5 + $0xf8] sm:$0xff]   ;;  %v1208_v32 = vcombine.low %v81_v31, %v81_v31  ;;  %v1209_v33 = vcombine.high %v81_v31, %v81_v31  ;;  %v1491_v35 = vld [vmem:[#allocation5 + $0x140] sm:$0xff]  }
  0x54   :  { %1301 = vmatprep.subr.bf16.mxu0 %v1469_v12  ;;  %v1484_v27 = vld [vmem:[#allocation5 + $0xb0] sm:$0xff]   ;;  %v1490_v34 = vld [vmem:[#allocation5 + $0xb8] sm:$0xff]   ;;  %v1494_v39 = vld [vmem:[#allocation5 + $0x100] sm:$0xff]  }
  0x55   :  { %1322 = vmatpush3.bf16.msra.mxu1 %v1468_v11  ;;  %v82_v36 = vld [vmem:[#allocation2 + $0x8] sm:$0xff]  ;;  %597 = vmatprep.mubr.bf16.mxu0 %v1209_v33  ;;  %v1495_v40 = vld [vmem:[#allocation5 + $0x180] sm:$0xff]   ;;  %v1502_v48 = vld [vmem:[#allocation5 + $0x158] sm:$0xff]  }
  0x56   :  { %1323 = vmatprep.subr.bf16.mxu1 %v1471_v14  ;;  %v1210_v37 = vcombine.low %v82_v36, %v82_v36  ;;  %v1211_v38 = vcombine.high %v82_v36, %v82_v36  ;;  %v1496_v41 = vld [vmem:[#allocation5 + $0x148] sm:$0xff]   ;;  %v1499_v45 = vld [vmem:[#allocation5 + $0x150] sm:$0xff]   ;;  %v1503_v49 = vld [vmem:[#allocation5 + $0x118] sm:$0xff]  }
  0x57   :  { %1302 = vmatpush3.bf16.msra.mxu0 %v1470_v13  ;;  %v1497_v43 = vld [vmem:[#allocation5 + $0x108] sm:$0xff]   ;;  %v1500_v46 = vld [vmem:[#allocation5 + $0x110] sm:$0xff]   ;;  %v1505_v50 = vld [vmem:[#allocation5 + $0x160] sm:$0xff]  }
  0x58   :  { %1303 = vmatprep.subr.bf16.mxu0 %v1473_v16  ;;  %637 = vmatprep.mubr.bf16.mxu1 %v1211_v38  ;;  %v1498_v44 = vld [vmem:[#allocation5 + $0x188] sm:$0xff]   ;;  %v1501_v47 = vld [vmem:[#allocation5 + $0x190] sm:$0xff]   ;;  %v1504_v51 = vld [vmem:[#allocation5 + $0x198] sm:$0xff]  }
  0x59   :  { %1324 = vmatpush3.bf16.msra.mxu1 %v1472_v15  ;;  %v1506_v52 = vld [vmem:[#allocation5 + $0x120] sm:$0xff]   ;;  %v1508_v53 = vld [vmem:[#allocation5 + $0x168] sm:$0xff]   ;;  %v1511_v56 = vld [vmem:[#allocation5 + $0x170] sm:$0xff]  }
  0x5a   :  { %1325 = vmatprep.subr.bf16.mxu1 %v1475_v18  ;;  %v1507_v54 = vld [vmem:[#allocation5 + $0x1a0] sm:$0xff]   ;;  %v1509_v55 = vld [vmem:[#allocation5 + $0x128] sm:$0xff]   ;;  %v1512_v58 = vld [vmem:[#allocation5 + $0x130] sm:$0xff]  }
  0x5b   :  { %1304 = vmatpush3.bf16.msra.mxu0 %v1474_v17  ;;  %v1510_v57 = vld [vmem:[#allocation5 + $0x1a8] sm:$0xff]   ;;  %v83_v59 = vld [vmem:[#allocation2 + $0x10] sm:$0xff]  ;;  %v1519_v2 = vld [vmem:[#allocation2 + $0x18] ss:$0 sps:$4 sm:$0xff]  }
  0x5c   :  { %1305 = vmatprep.subr.bf16.mxu0 %v1477_v20  ;;  %v1513_v60 = vld [vmem:[#allocation5 + $0x1b0] sm:$0xff]   ;;  %v1213_v61 = vcombine.high %v83_v59, %v83_v59  ;;  %v1514_v62 = vld [vmem:[#allocation5 + $0x178] sm:$0xff]   ;;  %v1212_v1 = vcombine.low %v83_v59, %v83_v59  ;;  %v1207_v4 = vld [vmem:[%s1829_s2] ss:$0 sm:$0xff] }
  0x5d   :  { %1326 = vmatpush3.bf16.msra.mxu1 %v1476_v19  ;;  %v1515_v63 = vld [vmem:[#allocation5 + $0x138] sm:$0xff]  }
  0x5e   :  { %1327 = vmatprep.subr.bf16.mxu1 %v1479_v22  ;;  %v1518_v0 = vld [vmem:[#allocation5 + $0x1b8] sm:$0xff]  }
  0x5f   :  { %1306 = vmatpush3.bf16.msra.mxu0 %v1478_v21 }
  0x60   :  { %1307 = vmatprep.subr.bf16.mxu0 %v1481_v24 }
  0x61   :  { %1328 = vmatpush3.bf16.msra.mxu1 %v1480_v23 }
  0x62   :  { %1329 = vmatprep.subr.bf16.mxu1 %v1483_v26 }
  0x63   :  { %1308 = vmatpush3.bf16.msra.mxu0 %v1482_v25 }
  0x64   :  { %1309 = vmatprep.subr.bf16.mxu0 %v1485_v28 }
  0x65   :  { %1330 = vmatpush3.bf16.msra.mxu1 %v1484_v27 }
  0x66   :  { %1331 = vmatprep.subr.bf16.mxu1 %v1487_v30 }
  0x67   :  { %1310 = vmatpush3.bf16.msra.mxu0 %v1486_v29 }
  0x68   :  { %1339 = vmatprep.subr.bf16.mxu0 %v1491_v35 }
  0x69   :  { %1332 = vmatpush3.bf16.msra.mxu1 %v1490_v34 }
  0x6a   :  { %598 = vmatmul.mubr.bf16.vlgmr.msra.gmra.mrb[0].mxu0 %v1208_v32  ;;  %1388 = vmatprep.subr.bf16.mxu1 %v1660_v42 }
  0x6b   :  { %1340 = vmatpush3.bf16.msra.mxu0 %v1494_v39  ;;  %677 = vmatprep.mubr.bf16.mxu0 %v1213_v61 }
  0x6c   :  { %638 = vmatmul.mubr.bf16.vlgmr.msra.gmra.mrb[0].mxu1 %v1210_v37  ;;  %1341 = vmatprep.subr.bf16.mxu0 %v1496_v41 }
  0x6d   :  { %1389 = vmatpush3.bf16.msra.mxu1 %v1495_v40  ;;  %1404 = vmatprep.mubr.msk.bf16.mxu1 %vm1661_vm0, %v1660_v42 }
  0x6e   :  { %1390 = vmatprep.subr.bf16.mxu1 %v1660_v42 }
  0x6f   :  { %1342 = vmatpush3.bf16.msra.mxu0 %v1497_v43 }
  0x70   :  { %1343 = vmatprep.subr.bf16.mxu0 %v1499_v45 }
  0x71   :  { %1391 = vmatpush3.bf16.msra.mxu1 %v1498_v44 }
  0x72   :  { %1392 = vmatprep.subr.bf16.mxu1 %v1660_v42 }
  0x73   :  { %1344 = vmatpush3.bf16.msra.mxu0 %v1500_v46 }
  0x74   :  { %1345 = vmatprep.subr.bf16.mxu0 %v1502_v48 }
  0x75   :  { %1393 = vmatpush3.bf16.msra.mxu1 %v1501_v47 }
  0x76   :  { %1394 = vmatprep.subr.bf16.mxu1 %v1660_v42 }
  0x77   :  { %1346 = vmatpush3.bf16.msra.mxu0 %v1503_v49 }
  0x78   :  { %1347 = vmatprep.subr.bf16.mxu0 %v1505_v50 }
  0x79   :  { %1395 = vmatpush3.bf16.msra.mxu1 %v1504_v51 }
  0x7a   :  { %1396 = vmatprep.subr.bf16.mxu1 %v1660_v42 }
  0x7b   :  { %1348 = vmatpush3.bf16.msra.mxu0 %v1506_v52 }
  0x7c   :  { %1349 = vmatprep.subr.bf16.mxu0 %v1508_v53 }
  0x7d   :  { %1397 = vmatpush3.bf16.msra.mxu1 %v1507_v54 }
  0x7e   :  { %1398 = vmatprep.subr.bf16.mxu1 %v1660_v42 }
  0x7f   :  { %1350 = vmatpush3.bf16.msra.mxu0 %v1509_v55 }
  0x80   :  { %1351 = vmatprep.subr.bf16.mxu0 %v1511_v56 }
  0x81   :  { %1399 = vmatpush3.bf16.msra.mxu1 %v1510_v57 }
  0x82   :  { %1400 = vmatprep.subr.bf16.mxu1 %v1660_v42 }
  0x83   :  { %1352 = vmatpush3.bf16.msra.mxu0 %v1512_v58 }
  0x84   :  { %1353 = vmatprep.subr.bf16.mxu0 %v1514_v62 }
  0x85   :  { %1401 = vmatpush3.bf16.msra.mxu1 %v1513_v60 }
  0x86   :  { %1402 = vmatprep.subr.bf16.mxu1 %v1660_v42 }
  0x87   :  { %1354 = vmatpush3.bf16.msra.mxu0 %v1515_v63 }
  0x88   :  { %1408 = vmatprep.subr.bf16.mxu0 %v1660_v42 }
  0x89   :  { %1403 = vmatpush3.bf16.msra.mxu1 %v1518_v0 }
  0x8a   :  { %678 = vmatmul.mubr.bf16.vlgmr.msra.gmra.mrb[4].mxu0 %v1212_v1  ;;  %1428 = vmatprep.subr.bf16.mxu1 %v1660_v42 }
  0x8b   :  { %1424 = vmatprep.mubr.msk.bf16.mxu0 %vm1661_vm0, %v1660_v42 }
  0x8c   :  { %1405 = vmatmul.mubr.bf16.vlgmr.msra.gmra.mrb[4].mxu1 %v1519_v2 }
  0x8d   :  { %1444 = vmatprep.mubr.msk.bf16.mxu1 %vm1661_vm0, %v1660_v42 }
 0x13d   :  { %v1311_v3 = vpop.f32.mrb[0].mxu0 }
 0x13e   :  { %v1312_v5 = vpop.f32.mrb[1].mxu0 }
 0x13f   :  { %v1313_v6 = vadd.f32 %v1312_v5, %v1311_v3  ;;  %v1314_v7 = vpop.f32.mrb[2].mxu0  ;;  %v1333_v8 = vpop.f32.mrb[0].mxu1 }
 0x140   :  { %v1315_v9 = vpop.f32.mrb[3].mxu0  ;;  %v1334_v10 = vpop.f32.mrb[1].mxu1 }
 0x141   :  { %v600_v11 = vadd.f32 %v1313_v6, %v1207_v4  ;;  %v1335_v12 = vadd.f32 %v1334_v10, %v1333_v8  ;;  %v1336_v13 = vpop.f32.mrb[2].mxu1 }
 0x142   :  { %v1337_v14 = vpop.f32.mrb[3].mxu1 }
 0x143   :  { %v640_v15 = vadd.f32 %v1335_v12, %v600_v11 }
 0x15d   :  { %v1355_v16 = vpop.f32.mrb[4].mxu0 }
 0x15e   :  { %v1356_v17 = vpop.f32.mrb[5].mxu0 }
 0x15f   :  { %v1357_v18 = vadd.f32 %v1356_v17, %v1355_v16  ;;  %v1358_v19 = vpop.f32.mrb[6].mxu0  ;;  %v719_v20 = vpop.f32.mrb[4].mxu1 }
 0x160   :  { %v1359_v21 = vpop.f32.mrb[7].mxu0  ;;  %v1406_v22 = vpop.f32.mrb[5].mxu1 }
 0x161   :  { %v680_v23 = vadd.f32 %v1357_v18, %v640_v15  ;;  %v722_v24 = vpop.f32.mrb[6].mxu1 }
 0x162   :  { %v1407_v25 = vpop.f32.mrb[7].mxu1 }
 0x163   :  { %v1779_v26 = vadd.f32 %v719_v20, %v680_v23 }
 0x165   :  { %725 = vmax.xlane.f32.xlu0 %v1779_v26 }
 0x1f2   :  { %v726_v27 = vpop.xlane.xlu0 %725 }
 0x1f3   :  { %vm727_vm1 = vcmp.ge.f32.partialorder %v1779_v26, %v726_v27 }
 0x1f4   :  { %v728_v28 = vsel %vm727_vm1, -inf, %v1779_v26 }
 0x1f5   :  { %729 = vmax.xlane.f32.xlu0 %v728_v28 }
 0x282   :  { %v730_v29 = vpop.xlane.xlu0 %729 }
 0x283   :  { %vm731_vm2 = vcmp.ge.f32.partialorder %v728_v28, %v730_v29 }
 0x284   :  { %v732_v30 = vsel %vm731_vm2, -inf, %v728_v28 }
 0x285   :  { %733 = vmax.xlane.f32.xlu1 %v732_v30 }
 0x312   :  { %v734_v31 = vpop.xlane.xlu1 %733 }
 0x313   :  { %vm735_vm3 = vcmp.ge.f32.partialorder %v732_v30, %v734_v31 }
 0x314   :  { %v736_v32 = vsel %vm735_vm3, -inf, %v732_v30 }
 0x315   :  { %737 = vmax.xlane.f32.xlu1 %v736_v32 }
 0x3a2   :  { %v738_v33 = vpop.xlane.xlu1 %737 }
 0x3a3   :  { %vm739_vm4 = vcmp.ge.f32.partialorder %v736_v32, %v738_v33 }
 0x3a4   :  { %v740_v34 = vsel %vm739_vm4, -inf, %v736_v32 }
 0x3a5   :  { %741 = vmax.xlane.f32.xlu0 %v740_v34 }
 0x432   :  { %v742_v35 = vpop.xlane.xlu0 %741 }
 0x433   :  { %vm743_vm5 = vcmp.ge.f32.partialorder %v740_v34, %v742_v35 }
 0x434   :  { %v744_v36 = vsel %vm743_vm5, -inf, %v740_v34 }
 0x435   :  { %745 = vmax.xlane.f32.xlu1 %v744_v36 }
 0x4c2   :  { %v746_v37 = vpop.xlane.xlu1 %745 }
 0x4c3   :  { %vm747_vm6 = vcmp.ge.f32.partialorder %v744_v36, %v746_v37 }
 0x4c4   :  { %v748_v38 = vsel %vm747_vm6, -inf, %v744_v36 }
 0x4c5   :  { %749 = vmax.xlane.f32.xlu0 %v748_v38 }
 0x552   :  { %v750_v39 = vpop.xlane.xlu0 %749 }
 0x553   :  { %vm751_vm7 = vcmp.ge.f32.partialorder %v748_v38, %v750_v39 }
 0x554   :  { %v752_v40 = vsel %vm751_vm7, -inf, %v748_v38 }
 0x555   :  { %753 = vmax.xlane.f32.xlu1 %v752_v40 }
 0x5e2   :  { %v754_v41 = vpop.xlane.xlu1 %753 }
 0x5e3   :  { %vm755_vm8 = vcmp.ge.f32.partialorder %v752_v40, %v754_v41  ;;  %v1520_v41 = vld [vmem:[#allocation7] sm:$0xff]  }
 0x5e4   :  { %v756_v43 = vsel %vm755_vm8, -inf, %v752_v40  ;;  %1409 = vmatpush3.bf16.msra.mxu0 %v1520_v41 }
 0x5e5   :  { %757 = vmax.xlane.f32.xlu0 %v756_v43  ;;  %1410 = vmatprep.subr.bf16.mxu0 %v1660_v42 }
 0x672   :  { %v758_v44 = vpop.xlane.xlu0 %757 }
 0x673   :  { %vm759_vm9 = vcmp.ge.f32.partialorder %v756_v43, %v758_v44  ;;  %v1522_v44 = vld [vmem:[#allocation7 + $0x10] sm:$0xff]  }
 0x674   :  { %v760_v45 = vsel %vm759_vm9, -inf, %v756_v43  ;;  %v1521_v43 = vld [vmem:[#allocation7 + $0x8] sm:$0xff]  }
 0x675   :  { %761 = vmax.xlane.f32.xlu1 %v760_v45  ;;  %1411 = vmatpush3.bf16.msra.mxu0 %v1521_v43 }
 0x676   :  { %1412 = vmatprep.subr.bf16.mxu0 %v1660_v42 }
 0x679   :  { %1413 = vmatpush3.bf16.msra.mxu0 %v1522_v44 }
 0x67a   :  { %1414 = vmatprep.subr.bf16.mxu0 %v1660_v42 }
 0x702   :  { %v762_v46 = vpop.xlane.xlu1 %761 }
 0x703   :  { %vm763_vm10 = vcmp.ge.f32.partialorder %v760_v45, %v762_v46  ;;  %v1524_v46 = vld [vmem:[#allocation7 + $0x20] sm:$0xff]  }
 0x704   :  { %v764_v47 = vsel %vm763_vm10, -inf, %v760_v45  ;;  %v1523_v45 = vld [vmem:[#allocation7 + $0x18] sm:$0xff]  }
 0x705   :  { %765 = vmax.xlane.f32.xlu0 %v764_v47  ;;  %1415 = vmatpush3.bf16.msra.mxu0 %v1523_v45  ;;  %v1283_v45 = vld [vmem:[%s1833_s6] ss:$0 sm:$0xff] }
 0x706   :  { %1416 = vmatprep.subr.bf16.mxu0 %v1660_v42 }
 0x709   :  { %1417 = vmatpush3.bf16.msra.mxu0 %v1524_v46 }
 0x70a   :  { %1418 = vmatprep.subr.bf16.mxu0 %v1660_v42 }
 0x792   :  { %v766_v48 = vpop.xlane.xlu0 %765 }
 0x793   :  { %vm767_vm11 = vcmp.ge.f32.partialorder %v764_v47, %v766_v48  ;;  %v1526_v48 = vld [vmem:[#allocation7 + $0x30] sm:$0xff]  }
 0x794   :  { %v768_v49 = vsel %vm767_vm11, -inf, %v764_v47  ;;  %v1525_v47 = vld [vmem:[#allocation7 + $0x28] sm:$0xff]  }
 0x795   :  { %769 = vmax.xlane.f32.xlu1 %v768_v49  ;;  %1419 = vmatpush3.bf16.msra.mxu0 %v1525_v47 }
 0x796   :  { %1420 = vmatprep.subr.bf16.mxu0 %v1660_v42 }
 0x799   :  { %1421 = vmatpush3.bf16.msra.mxu0 %v1526_v48 }
 0x79a   :  { %1422 = vmatprep.subr.bf16.mxu0 %v1660_v42 }
 0x822   :  { %v770_v50 = vpop.xlane.xlu1 %769 }
 0x823   :  { %vm771_vm12 = vcmp.ge.f32.partialorder %v768_v49, %v770_v50 }
 0x824   :  { %v772_v51 = vsel %vm771_vm12, -inf, %v768_v49  ;;  %v1527_v49 = vld [vmem:[#allocation7 + $0x38] sm:$0xff]  }
 0x825   :  { %773 = vmax.xlane.f32.xlu0 %v772_v51  ;;  %1423 = vmatpush3.bf16.msra.mxu0 %v1527_v49 }
 0x8b2   :  { %v774_v52 = vpop.xlane.xlu0 %773 }
 0x8b3   :  { %vm775_vm13 = vcmp.ge.f32.partialorder %v772_v51, %v774_v52 }
 0x8b4   :  { %v776_v53 = vsel %vm775_vm13, -inf, %v772_v51 }
 0x8b5   :  { %777 = vmax.xlane.f32.xlu1 %v776_v53 }
 0x942   :  { %v778_v54 = vpop.xlane.xlu1 %777 }
 0x943   :  { %vm779_vm14 = vcmp.ge.f32.partialorder %v776_v53, %v778_v54  ;;  %v1271_v54 = vld [vmem:[%s1831_s4] ss:$0 sm:$0xff] }
 0x944   :  { %v780_v55 = vsel %vm779_vm14, -inf, %v776_v53  ;;  %v1281_v53 = vpack.c.bf16 %v1779_v26, %v1779_v26 }
 0x945   :  { %781 = vmax.xlane.f32.xlu0 %v780_v55 }
 0x9d2   :  { %v782_v56 = vpop.xlane.xlu0 %781 }
 0x9d3   :  { %vm783_vm15 = vcmp.ge.f32.partialorder %v780_v55, %v782_v56 }
 0x9d4   :  { %v784_v57 = vsel %vm783_vm15, -inf, %v780_v55 }
 0x9d5   :  { %785 = vmax.xlane.f32.xlu1 %v784_v57 }
 0xa62   :  { %v786_v58 = vpop.xlane.xlu1 %785 }
 0xa63   :  { %vm787_vm0 = vcmp.ge.f32.partialorder %v784_v57, %v786_v58 }
 0xa64   :  { %v788_v59 = vsel %vm787_vm0, -inf, %v784_v57 }
 0xa65   :  { %789 = vmax.xlane.f32.xlu0 %v788_v59 }
 0xaf2   :  { %v790_v60 = vpop.xlane.xlu0 %789 }
 0xaf3   :  { %vm791_vm1 = vcmp.ge.f32.partialorder %v788_v59, %v790_v60 }
 0xaf4   :  { %v792_v61 = vsel %vm791_vm1, -inf, %v788_v59 }
 0xaf5   :  { %793 = vmax.xlane.f32.xlu1 %v792_v61 }
 0xb82   :  { %v794_v62 = vpop.xlane.xlu1 %793 }
 0xb83   :  { %vm795_vm2 = vcmp.ge.f32.partialorder %v792_v61, %v794_v62 }
 0xb84   :  { %v796_v63 = vsel %vm795_vm2, -inf, %v792_v61 }
 0xb85   :  { %797 = vmax.xlane.f32.xlu0 %v796_v63 }
 0xc12   :  { %v798_v0 = vpop.xlane.xlu0 %797 }
 0xc13   :  { %vm799_vm3 = vcmp.ge.f32.partialorder %v796_v63, %v798_v0 }
 0xc14   :  { %v800_v1 = vsel %vm799_vm3, -inf, %v796_v63 }
 0xc15   :  { %801 = vmax.xlane.f32.xlu1 %v800_v1 }
 0xca2   :  { %v802_v2 = vpop.xlane.xlu1 %801 }
 0xca3   :  { %vm803_vm4 = vcmp.ge.f32.partialorder %v800_v1, %v802_v2 }
 0xca4   :  { %v804_v3 = vsel %vm803_vm4, -inf, %v800_v1 }
 0xca5   :  { %805 = vmax.xlane.f32.xlu0 %v804_v3 }
 0xd32   :  { %v806_v4 = vpop.xlane.xlu0 %805 }
 0xd33   :  { %vm807_vm5 = vcmp.ge.f32.partialorder %v804_v3, %v806_v4 }
 0xd34   :  { %v808_v5 = vsel %vm807_vm5, -inf, %v804_v3 }
 0xd35   :  { %809 = vmax.xlane.f32.xlu1 %v808_v5 }
 0xdc2   :  { %v810_v6 = vpop.xlane.xlu1 %809 }
 0xdc3   :  { %vm811_vm6 = vcmp.ge.f32.partialorder %v808_v5, %v810_v6 }
 0xdc4   :  { %v812_v7 = vsel %vm811_vm6, -inf, %v808_v5 }
 0xdc5   :  { %813 = vmax.xlane.f32.xlu0 %v812_v7 }
 0xe52   :  { %v814_v8 = vpop.xlane.xlu0 %813 }
 0xe53   :  { %vm815_vm7 = vcmp.ge.f32.partialorder %v812_v7, %v814_v8 }
 0xe54   :  { %v816_v9 = vsel %vm815_vm7, -inf, %v812_v7 }
 0xe55   :  { %817 = vmax.xlane.f32.xlu1 %v816_v9 }
 0xee2   :  { %v818_v10 = vpop.xlane.xlu1 %817 }
 0xee3   :  { %vm819_vm8 = vcmp.ge.f32.partialorder %v816_v9, %v818_v10 }
 0xee4   :  { %v820_v11 = vsel %vm819_vm8, -inf, %v816_v9 }
 0xee5   :  { %821 = vmax.xlane.f32.xlu0 %v820_v11 }
 0xf72   :  { %v822_v12 = vpop.xlane.xlu0 %821 }
 0xf73   :  { %vm823_vm9 = vcmp.ge.f32.partialorder %v820_v11, %v822_v12 }
 0xf74   :  { %v824_v13 = vsel %vm823_vm9, -inf, %v820_v11 }
 0xf75   :  { %825 = vmax.xlane.f32.xlu1 %v824_v13 }
0x1002   :  { %v826_v14 = vpop.xlane.xlu1 %825 }
0x1003   :  { %vm827_vm10 = vcmp.ge.f32.partialorder %v824_v13, %v826_v14 }
0x1004   :  { %v828_v15 = vsel %vm827_vm10, -inf, %v824_v13 }
0x1005   :  { %829 = vmax.xlane.f32.xlu0 %v828_v15 }
0x1092   :  { %v830_v16 = vpop.xlane.xlu0 %829 }
0x1093   :  { %vm831_vm11 = vcmp.ge.f32.partialorder %v828_v15, %v830_v16 }
0x1094   :  { %v832_v17 = vsel %vm831_vm11, -inf, %v828_v15 }
0x1095   :  { %833 = vmax.xlane.f32.xlu1 %v832_v17 }
0x1122   :  { %v834_v18 = vpop.xlane.xlu1 %833 }
0x1123   :  { %vm835_vm12 = vcmp.ge.f32.partialorder %v832_v17, %v834_v18 }
0x1124   :  { %v836_v19 = vsel %vm835_vm12, -inf, %v832_v17 }
0x1125   :  { %837 = vmax.xlane.f32.xlu0 %v836_v19 }
0x11b2   :  { %v838_v20 = vpop.xlane.xlu0 %837 }
0x11b3   :  { %vm839_vm13 = vcmp.ge.f32.partialorder %v836_v19, %v838_v20 }
0x11b4   :  { %v840_v21 = vsel %vm839_vm13, -inf, %v836_v19 }
0x11b5   :  { %841 = vmax.xlane.f32.xlu1 %v840_v21 }
0x1242   :  { %v842_v22 = vpop.xlane.xlu1 %841 }
0x1243   :  { %vm843_vm14 = vcmp.ge.f32.partialorder %v840_v21, %v842_v22 }
0x1244   :  { %v844_v23 = vsel %vm843_vm14, -inf, %v840_v21 }
0x1245   :  { %845 = vmax.xlane.f32.xlu0 %v844_v23 }
0x12d2   :  { %v846_v24 = vpop.xlane.xlu0 %845 }
0x12d3   :  { %vm847_vm15 = vcmp.ge.f32.partialorder %v844_v23, %v846_v24 }
0x12d4   :  { %v848_v25 = vsel %vm847_vm15, -inf, %v844_v23 }
0x12d5   :  { %849 = vmax.xlane.f32.xlu1 %v848_v25 }
0x1362   :  { %v850_v27 = vpop.xlane.xlu1 %849 }
0x1363   :  { %vm851_vm0 = vcmp.ge.f32.partialorder %v848_v25, %v850_v27 }
0x1364   :  { %v852_v28 = vsel %vm851_vm0, -inf, %v848_v25 }
0x1365   :  { %853 = vmax.xlane.f32.xlu0 %v852_v28 }
0x13f2   :  { %v854_v29 = vpop.xlane.xlu0 %853 }
0x13f3   :  { %vm855_vm1 = vcmp.ge.f32.partialorder %v852_v28, %v854_v29 }
0x13f4   :  { %v856_v30 = vsel %vm855_vm1, -inf, %v852_v28 }
0x13f5   :  { %857 = vmax.xlane.f32.xlu1 %v856_v30 }
0x1482   :  { %v858_v31 = vpop.xlane.xlu1 %857 }
0x1483   :  { %vm859_vm2 = vcmp.ge.f32.partialorder %v856_v30, %v858_v31 }
0x1484   :  { %v860_v32 = vsel %vm859_vm2, -inf, %v856_v30 }
0x1485   :  { %861 = vmax.xlane.f32.xlu0 %v860_v32 }
0x1512   :  { %v862_v33 = vpop.xlane.xlu0 %861 }
0x1513   :  { %vm863_vm3 = vcmp.ge.f32.partialorder %v860_v32, %v862_v33  ;;  %v1529_v33 = vld [vmem:[#allocation8 + $0x8] sm:$0xff]  }
0x1514   :  { %v864_v34 = vsel %vm863_vm3, -inf, %v860_v32  ;;  %v1528_v32 = vld [vmem:[#allocation8] sm:$0xff]  }
0x1515   :  { %865 = vmax.xlane.f32.xlu1 %v864_v34  ;;  %1429 = vmatpush3.bf16.msra.mxu1 %v1528_v32 }
0x1516   :  { %1430 = vmatprep.subr.bf16.mxu1 %v1660_v42 }
0x1519   :  { %1431 = vmatpush3.bf16.msra.mxu1 %v1529_v33 }
0x151a   :  { %1432 = vmatprep.subr.bf16.mxu1 %v1660_v42 }
0x15a2   :  { %v866_v35 = vpop.xlane.xlu1 %865 }
0x15a3   :  { %vm867_vm4 = vcmp.ge.f32.partialorder %v864_v34, %v866_v35  ;;  %v1531_v35 = vld [vmem:[#allocation8 + $0x18] sm:$0xff]  }
0x15a4   :  { %v868_v36 = vsel %vm867_vm4, -inf, %v864_v34  ;;  %v1530_v34 = vld [vmem:[#allocation8 + $0x10] sm:$0xff]  }
0x15a5   :  { %869 = vmax.xlane.f32.xlu0 %v868_v36  ;;  %1433 = vmatpush3.bf16.msra.mxu1 %v1530_v34 }
0x15a6   :  { %1434 = vmatprep.subr.bf16.mxu1 %v1660_v42 }
0x15a9   :  { %1435 = vmatpush3.bf16.msra.mxu1 %v1531_v35 }
0x15aa   :  { %1436 = vmatprep.subr.bf16.mxu1 %v1660_v42 }
0x1632   :  { %v870_v37 = vpop.xlane.xlu0 %869 }
0x1633   :  { %vm871_vm5 = vcmp.ge.f32.partialorder %v868_v36, %v870_v37  ;;  %v1533_v37 = vld [vmem:[#allocation8 + $0x28] sm:$0xff]  }
0x1634   :  { %v872_v38 = vsel %vm871_vm5, -inf, %v868_v36  ;;  %v1532_v36 = vld [vmem:[#allocation8 + $0x20] sm:$0xff]  }
0x1635   :  { %873 = vmax.xlane.f32.xlu1 %v872_v38  ;;  %1437 = vmatpush3.bf16.msra.mxu1 %v1532_v36 }
0x1636   :  { %1438 = vmatprep.subr.bf16.mxu1 %v1660_v42 }
0x1639   :  { %1439 = vmatpush3.bf16.msra.mxu1 %v1533_v37 }
0x163a   :  { %1440 = vmatprep.subr.bf16.mxu1 %v1660_v42 }
0x16c2   :  { %v874_v39 = vpop.xlane.xlu1 %873 }
0x16c3   :  { %vm875_vm6 = vcmp.ge.f32.partialorder %v872_v38, %v874_v39  ;;  %v1535_v39 = vld [vmem:[#allocation8 + $0x38] sm:$0xff]  }
0x16c4   :  { %v876_v40 = vsel %vm875_vm6, -inf, %v872_v38  ;;  %v1534_v38 = vld [vmem:[#allocation8 + $0x30] sm:$0xff]  }
0x16c5   :  { %877 = vmax.xlane.f32.xlu0 %v876_v40  ;;  %1441 = vmatpush3.bf16.msra.mxu1 %v1534_v38 }
0x16c6   :  { %1442 = vmatprep.subr.bf16.mxu1 %v1660_v42 }
0x16c9   :  { %1443 = vmatpush3.bf16.msra.mxu1 %v1535_v39 }
0x1752   :  { %v878_v50 = vpop.xlane.xlu0 %877 }
0x1753   :  { %vm879_vm7 = vcmp.ge.f32.partialorder %v876_v40, %v878_v50 }
0x1754   :  { %v880_v51 = vsel %vm879_vm7, -inf, %v876_v40 }
0x1755   :  { %881 = vmax.xlane.f32.xlu1 %v880_v51 }
0x17e2   :  { %v882_v52 = vpop.xlane.xlu1 %881 }
0x17e3   :  { %vm883_vm8 = vcmp.ge.f32.partialorder %v1779_v26, %v882_v52 }
0x17e4   :  { %vm1280_vm9 = vmpackc.low %vm883_vm8, %vm883_vm8 }
0x17e5   :  { %1425 = vmatmul.mubr.msk.bf16.vlgmr.msra.gmra.mrb[8].mxu0 %vm1280_vm9, %v1281_v53 }
0x18b8   :  { %v991_v55 = vpop.f32.mrb[8].mxu0 }
0x18b9   :  { %v1797_v56 = vadd.f32 %v1271_v54, %v991_v55  ;;  %v1426_v57 = vpop.f32.mrb[9].mxu0 }
0x18ba   :  { %v994_v58 = vpop.f32.mrb[10].mxu0 }
0x18bb   :  { %997 = vmax.xlane.f32.xlu0 %v1797_v56  ;;  %v1427_v59 = vpop.f32.mrb[11].mxu0  ;;  %v1293_v44 = vpack.c.bf16 %v1797_v56, %v1797_v56 }
0x1948   :  { %v998_v60 = vpop.xlane.xlu0 %997 }
0x1949   :  { %vm999_vm10 = vcmp.ge.f32.partialorder %v1797_v56, %v998_v60 }
0x194a   :  { %v1000_v61 = vsel %vm999_vm10, -inf, %v1797_v56 }
0x194b   :  { %1001 = vmax.xlane.f32.xlu1 %v1000_v61 }
0x19d8   :  { %v1002_v26 = vpop.xlane.xlu1 %1001 }
0x19d9   :  { %vm1003_vm11 = vcmp.ge.f32.partialorder %v1000_v61, %v1002_v26 }
0x19da   :  { %v1004_v62 = vsel %vm1003_vm11, -inf, %v1000_v61 }
0x19db   :  { %1005 = vmax.xlane.f32.xlu0 %v1004_v62 }
0x1a68   :  { %v1006_v63 = vpop.xlane.xlu0 %1005 }
0x1a69   :  { %vm1007_vm12 = vcmp.ge.f32.partialorder %v1004_v62, %v1006_v63 }
0x1a6a   :  { %v1008_v0 = vsel %vm1007_vm12, -inf, %v1004_v62 }
0x1a6b   :  { %1009 = vmax.xlane.f32.xlu1 %v1008_v0 }
0x1af8   :  { %v1010_v1 = vpop.xlane.xlu1 %1009 }
0x1af9   :  { %vm1011_vm13 = vcmp.ge.f32.partialorder %v1008_v0, %v1010_v1 }
0x1afa   :  { %v1012_v2 = vsel %vm1011_vm13, -inf, %v1008_v0 }
0x1afb   :  { %1013 = vmax.xlane.f32.xlu0 %v1012_v2 }
0x1b88   :  { %v1014_v3 = vpop.xlane.xlu0 %1013 }
0x1b89   :  { %vm1015_vm14 = vcmp.ge.f32.partialorder %v1012_v2, %v1014_v3 }
0x1b8a   :  { %v1016_v4 = vsel %vm1015_vm14, -inf, %v1012_v2 }
0x1b8b   :  { %1017 = vmax.xlane.f32.xlu1 %v1016_v4 }
0x1c18   :  { %v1018_v5 = vpop.xlane.xlu1 %1017 }
0x1c19   :  { %vm1019_vm15 = vcmp.ge.f32.partialorder %v1016_v4, %v1018_v5 }
0x1c1a   :  { %v1020_v6 = vsel %vm1019_vm15, -inf, %v1016_v4 }
0x1c1b   :  { %1021 = vmax.xlane.f32.xlu0 %v1020_v6 }
0x1ca8   :  { %v1022_v7 = vpop.xlane.xlu0 %1021 }
0x1ca9   :  { %vm1023_vm0 = vcmp.ge.f32.partialorder %v1020_v6, %v1022_v7 }
0x1caa   :  { %v1024_v8 = vsel %vm1023_vm0, -inf, %v1020_v6 }
0x1cab   :  { %1025 = vmax.xlane.f32.xlu1 %v1024_v8 }
0x1d38   :  { %v1026_v9 = vpop.xlane.xlu1 %1025 }
0x1d39   :  { %vm1027_vm1 = vcmp.ge.f32.partialorder %v1024_v8, %v1026_v9 }
0x1d3a   :  { %v1028_v10 = vsel %vm1027_vm1, -inf, %v1024_v8 }
0x1d3b   :  { %1029 = vmax.xlane.f32.xlu0 %v1028_v10 }
0x1dc8   :  { %v1030_v11 = vpop.xlane.xlu0 %1029 }
0x1dc9   :  { %vm1031_vm2 = vcmp.ge.f32.partialorder %v1028_v10, %v1030_v11 }
0x1dca   :  { %v1032_v12 = vsel %vm1031_vm2, -inf, %v1028_v10 }
0x1dcb   :  { %1033 = vmax.xlane.f32.xlu1 %v1032_v12 }
0x1e58   :  { %v1034_v13 = vpop.xlane.xlu1 %1033 }
0x1e59   :  { %vm1035_vm3 = vcmp.ge.f32.partialorder %v1032_v12, %v1034_v13 }
0x1e5a   :  { %v1036_v14 = vsel %vm1035_vm3, -inf, %v1032_v12 }
0x1e5b   :  { %1037 = vmax.xlane.f32.xlu0 %v1036_v14 }
0x1ee8   :  { %v1038_v15 = vpop.xlane.xlu0 %1037 }
0x1ee9   :  { %vm1039_vm4 = vcmp.ge.f32.partialorder %v1036_v14, %v1038_v15 }
0x1eea   :  { %v1040_v16 = vsel %vm1039_vm4, -inf, %v1036_v14 }
0x1eeb   :  { %1041 = vmax.xlane.f32.xlu1 %v1040_v16 }
0x1f78   :  { %v1042_v17 = vpop.xlane.xlu1 %1041 }
0x1f79   :  { %vm1043_vm5 = vcmp.ge.f32.partialorder %v1040_v16, %v1042_v17 }
0x1f7a   :  { %v1044_v18 = vsel %vm1043_vm5, -inf, %v1040_v16 }
0x1f7b   :  { %1045 = vmax.xlane.f32.xlu0 %v1044_v18 }
0x2008   :  { %v1046_v19 = vpop.xlane.xlu0 %1045 }
0x2009   :  { %vm1047_vm6 = vcmp.ge.f32.partialorder %v1044_v18, %v1046_v19 }
0x200a   :  { %v1048_v20 = vsel %vm1047_vm6, -inf, %v1044_v18 }
0x200b   :  { %1049 = vmax.xlane.f32.xlu1 %v1048_v20 }
0x2098   :  { %v1050_v21 = vpop.xlane.xlu1 %1049 }
0x2099   :  { %vm1051_vm7 = vcmp.ge.f32.partialorder %v1048_v20, %v1050_v21 }
0x209a   :  { %v1052_v22 = vsel %vm1051_vm7, -inf, %v1048_v20 }
0x209b   :  { %1053 = vmax.xlane.f32.xlu0 %v1052_v22 }
0x2128   :  { %v1054_v23 = vpop.xlane.xlu0 %1053 }
0x2129   :  { %vm1055_vm8 = vcmp.ge.f32.partialorder %v1052_v22, %v1054_v23 }
0x212a   :  { %v1056_v24 = vsel %vm1055_vm8, -inf, %v1052_v22 }
0x212b   :  { %1057 = vmax.xlane.f32.xlu1 %v1056_v24 }
0x21b8   :  { %v1058_v25 = vpop.xlane.xlu1 %1057 }
0x21b9   :  { %vm1059_vm9 = vcmp.ge.f32.partialorder %v1056_v24, %v1058_v25 }
0x21ba   :  { %v1060_v27 = vsel %vm1059_vm9, -inf, %v1056_v24 }
0x21bb   :  { %1061 = vmax.xlane.f32.xlu0 %v1060_v27 }
0x2248   :  { %v1062_v28 = vpop.xlane.xlu0 %1061 }
0x2249   :  { %vm1063_vm10 = vcmp.ge.f32.partialorder %v1060_v27, %v1062_v28 }
0x224a   :  { %v1064_v29 = vsel %vm1063_vm10, -inf, %v1060_v27 }
0x224b   :  { %1065 = vmax.xlane.f32.xlu1 %v1064_v29 }
0x22d8   :  { %v1066_v30 = vpop.xlane.xlu1 %1065 }
0x22d9   :  { %vm1067_vm11 = vcmp.ge.f32.partialorder %v1064_v29, %v1066_v30 }
0x22da   :  { %v1068_v31 = vsel %vm1067_vm11, -inf, %v1064_v29 }
0x22db   :  { %1069 = vmax.xlane.f32.xlu0 %v1068_v31 }
0x2368   :  { %v1070_v40 = vpop.xlane.xlu0 %1069 }
0x2369   :  { %vm1071_vm12 = vcmp.ge.f32.partialorder %v1068_v31, %v1070_v40 }
0x236a   :  { %v1072_v41 = vsel %vm1071_vm12, -inf, %v1068_v31 }
0x236b   :  { %1073 = vmax.xlane.f32.xlu1 %v1072_v41 }
0x23f8   :  { %v1074_v43 = vpop.xlane.xlu1 %1073 }
0x23f9   :  { %vm1075_vm13 = vcmp.ge.f32.partialorder %v1797_v56, %v1074_v43 }
0x23fa   :  { %vm1292_vm14 = vmpackc.low %vm1075_vm13, %vm1075_vm13 }
0x23fb   :  { %1445 = vmatmul.mubr.msk.bf16.vlgmr.msra.gmra.mrb[8].mxu1 %vm1292_vm14, %v1293_v44 }
0x24ce   :  { %v1183_v42 = vpop.f32.mrb[8].mxu1 }
0x24cf   :  { %v1184_v46 = vadd.f32 %v1283_v45, %v1183_v42  ;;  %v1446_v47 = vpop.f32.mrb[9].mxu1 }
0x24d0   :  { %v1186_v48 = vpop.f32.mrb[10].mxu1 }
0x24d1   :  { %1189 = vst [vmem:[#allocation10] sm:$0xff] %v1184_v46  ;;  %v1447_v49 = vpop.f32.mrb[11].mxu1 }
0x24d2   :  { %1635 = shalt.err (!%p1632_p8)
}
0x24d3   :  { %s1636_s6 = scalar_lea.hbm %s1834_s7, 128 }
0x24d4   :  { %p1637_p9 = scmp.ne.s32.totalorder %s1834_s7, %s1636_s6  ;;  %p1640_p10 = scmp.lt.u32.totalorder %s1636_s6, %s1834_s7 }
0x24d6   :  { %p1642_p11 = pnand %p1640_p10, %p1637_p9 }
0x24d8   :  { %1645 = shalt.err (!%p1642_p11)
}
0x24d9   :  { %1199 = dma.vmem_to_hbm [thread:$0]  %s1197_s28, 128, %s1834_s7, [#allocation4]  }
0x24da   :  { %1652 = dma.done.wait [#allocation4], 128  }
0x24db   :  { %1653 = vsyncadd [#allocation4], 4294967168 }
0x24dc   :  { %1203 = vsyncpa [#allocation3], 1 }
0x24dd   :  { %1204 = vsyncpa [#allocation6], 1 }
0x24de   :  { %1205 = vsyncpa [#allocation9], 1 }
0x24df   :  { %1206 = vsyncpa [#allocation4], 1 }

</bundles_post_ra>
